<compile_context>
chip_gen: v5e
topology: v5e:2x2
jax: 0.10.0
libtpu: 0.0.40
codegen_flags: <defaults>
</compile_context>

<pallas_src>
import jax
import jax.numpy as jnp
from jax.experimental import pallas as pl
from jax.experimental.pallas import tpu as pltpu

_LANE = 128
_SUBLANE = 8


def _round_up(v, m):
    return ((v + m - 1) // m) * m


def _pick_block_n(n):
    """Batch-tile size. The call is HBM-bound on x, so: big tiles to amortize
    per-grid-step overhead, but >= 2 grid steps for mid/large batches so the
    'parallel' axis can feed both v7x TensorCores."""
    if n >= 2048:
        return 1024                              # 24 MiB double-buffered f32 x tile
    if n > 512:
        return _round_up((n + 1) // 2, _SUBLANE)  # ~2 grid steps
    return n                                      # single full-extent block


def _mlp_kernel(x_ref, w1_ref, b1_ref, w2_ref, b2_ref, w3_ref, b3_ref, o_ref):
    # x_ref : (block_n, d_in)           f32
    # w1_ref: (d_in, 64)                f32   b1_ref: (1, 64)   f32
    # w2_ref: (64, 32)                  f32   b2_ref: (1, 32)   f32
    # w3_ref: (32, d_out_pad=128)       f32   b3_ref: (1, 128)  f32
    x = x_ref[...]

    h1 = jnp.dot(x, w1_ref[...], preferred_element_type=jnp.float32) + b1_ref[...]
    h1 = jnp.maximum(h1, 0.0)

    h2 = jnp.dot(h1, w2_ref[...], preferred_element_type=jnp.float32) + b2_ref[...]
    h2 = jnp.maximum(h2, 0.0)

    out = jnp.dot(h2, w3_ref[...], preferred_element_type=jnp.float32) + b3_ref[...]
    o_ref[...] = out.astype(o_ref.dtype)


@jax.jit
def mlp_forward(x_nchw, w1, b1, w2, b2, w3, b3):
    """Forward pass of the MLP.

    Args:
      x_nchw: float32 [N, C, H, W] input (NCHW, like PyTorch).
      w1, b1: Linear(inputSize, 64) params, w1 pre-transposed to (inputSize, 64).
      w2, b2: Linear(64, 32) params, w2 as (64, 32).
      w3, b3: Linear(32, outputSize) params, w3 as (32, outputSize).

    Returns:
      float32 [N, outputSize] logits.
    """
    n = x_nchw.shape[0]
    d_in = w1.shape[0]
    h1_dim = w1.shape[1]
    h2_dim = w2.shape[1]
    d_out = w3.shape[1]

    # nn.Flatten: row-major flatten of (C, H, W) -> C*H*W (glue, not hot path).
    x = x_nchw.reshape(n, d_in).astype(jnp.float32)

    # Lane-dense output: pad d_out to a multiple of 128 (unmasked vst path).
    d_out_pad = _round_up(d_out, _LANE)
    w3_p = jnp.pad(w3.astype(jnp.float32), ((0, 0), (0, d_out_pad - d_out)))
    b3_p = jnp.pad(b3.reshape(1, -1).astype(jnp.float32),
                   ((0, 0), (0, d_out_pad - d_out)))

    w1_f = w1.astype(jnp.float32)
    w2_f = w2.astype(jnp.float32)
    b1_2d = b1.reshape(1, -1).astype(jnp.float32)
    b2_2d = b2.reshape(1, -1).astype(jnp.float32)

    block_n = _pick_block_n(n)
    grid = (pl.cdiv(n, block_n),)

    # VMEM budget: x/out tiles double-buffered + parameters (conservatively x2).
    vmem_est = (2 * block_n * d_in * 4
                + 2 * block_n * d_out_pad * 4
                + 2 * (d_in * h1_dim + h1_dim * h2_dim + h2_dim * d_out_pad
                       + h1_dim + h2_dim + d_out_pad) * 4)
    vmem_limit = None
    if vmem_est > 14 * (1 << 20):      # beyond the v5e default scoped window
        vmem_limit = min(int(vmem_est * 1.25) + (2 << 20), 56 * (1 << 20))

    # Advisory cost: HBM-DMA bound (x dominates), tiny FLOPs (true d_out, not padded).
    cost = pl.CostEstimate(
        flops=2 * n * (d_in * h1_dim + h1_dim * h2_dim + h2_dim * d_out),
        transcendentals=0,
        bytes_accessed=(x.size * 4
                        + (w1_f.size + w2_f.size + w3_p.size
                           + b1_2d.size + b2_2d.size + b3_p.size) * 4
                        + n * d_out_pad * 4),
    )

    out_padded = pl.pallas_call(
        _mlp_kernel,
        out_shape=jax.ShapeDtypeStruct((n, d_out_pad), jnp.float32),
        grid=grid,
        in_specs=[
            # Activation tile: advances with the grid, double-buffered.
            pl.BlockSpec((block_n, d_in), lambda i: (i, 0)),
            # Parameters: constant index_map -> fetched once, VMEM-resident.
            pl.BlockSpec((d_in, h1_dim), lambda i: (0, 0)),
            pl.BlockSpec((1, h1_dim), lambda i: (0, 0)),
            pl.BlockSpec((h1_dim, h2_dim), lambda i: (0, 0)),
            pl.BlockSpec((1, h2_dim), lambda i: (0, 0)),
            pl.BlockSpec((h2_dim, d_out_pad), lambda i: (0, 0)),
            pl.BlockSpec((1, d_out_pad), lambda i: (0, 0)),
        ],
        out_specs=pl.BlockSpec((block_n, d_out_pad), lambda i: (i, 0)),
        compiler_params=pltpu.CompilerParams(
            dimension_semantics=("parallel",),
            vmem_limit_bytes=vmem_limit,
        ),
        cost_estimate=cost,
    )(x, w1_f, b1_2d, w2_f, b2_2d, w3_p, b3_p)

    # Column slice back to the true output width (consumer could fuse this).
    return out_padded[:, :d_out]


def _torch_linear_init(key, fan_in, fan_out):
    """PyTorch-style nn.Linear init: U(-1/sqrt(fan_in), 1/sqrt(fan_in)).

    Returns (W of shape (fan_in, fan_out), b of shape (fan_out,)) — weight is
    already transposed to (in, out) so the kernel computes x @ W.
    """
    kw, kb = jax.random.split(key)
    bound = 1.0 / jnp.sqrt(jnp.float32(fan_in))
    w = jax.random.uniform(kw, (fan_in, fan_out), jnp.float32, -bound, bound)
    b = jax.random.uniform(kb, (fan_out,), jnp.float32, -bound, bound)
    return w, b


def reference_mlp(x_nchw, w1, b1, w2, b2, w3, b3):
    x = x_nchw.reshape(x_nchw.shape[0], -1).astype(jnp.float32)
    h1 = jnp.maximum(x @ w1 + b1, 0.0)
    h2 = jnp.maximum(h1 @ w2 + b2, 0.0)
    return h2 @ w3 + b3


# TODO(synk): loss (CrossEntropyLoss) and configure_optimizers (Adam) are
# training-time utilities with no forward-pass Pallas equivalent; only the
# module's forward() is implemented here.

if __name__ == "__main__":
    # MLP() defaults: inputSize = 32*32*3 = 3072, outputSize = 10.
    batch, C, H, W = 2, 3, 32, 32
    input_size = C * H * W
    output_size = 10

    root = jax.random.PRNGKey(0)
    kx, k1, k2, k3 = jax.random.split(root, 4)

    x = jax.random.normal(kx, (batch, C, H, W), jnp.float32)
    w1, b1 = _torch_linear_init(k1, input_size, 64)
    w2, b2 = _torch_linear_init(k2, 64, 32)
    w3, b3 = _torch_linear_init(k3, 32, output_size)

    out = mlp_forward(x, w1, b1, w2, b2, w3, b3)
    out = jax.block_until_ready(out)

    ref = reference_mlp(x, w1, b1, w2, b2, w3, b3)
    assert out.shape == (batch, output_size)
    # f32 end-to-end (MXU default-precision accumulation) => close agreement.
    assert jnp.allclose(out, ref, atol=2e-2, rtol=2e-2), (
        f"max abs diff {jnp.max(jnp.abs(out - ref))}")

    print("KERNEL_OK")
</pallas_src>

<mosaic_0001>
module attributes {stable_mosaic.version = 11 : i64} {
  func.func @_mlp_kernel(%arg0: i32, %arg1: memref<2x3072xf32, #tpu.memory_space<vmem>>, %arg2: memref<3072x64xf32, #tpu.memory_space<vmem>>, %arg3: memref<1x64xf32, #tpu.memory_space<vmem>>, %arg4: memref<64x32xf32, #tpu.memory_space<vmem>>, %arg5: memref<1x32xf32, #tpu.memory_space<vmem>>, %arg6: memref<32x128xf32, #tpu.memory_space<vmem>>, %arg7: memref<1x128xf32, #tpu.memory_space<vmem>>, %arg8: memref<2x128xf32, #tpu.memory_space<vmem>>) attributes {dimension_semantics = [#tpu.dimension_semantics<parallel>], iteration_bounds = array<i64: 1>, scalar_prefetch = 0 : i64, scratch_operands = 0 : i64, tpu.core_type = #tpu.core_type<tc>, window_params = [{transform_indices = @transform_0, window_bounds = array<i64: 2, 3072>}, {pipeline_mode = #tpu.pipeline_mode<synchronous>, transform_indices = @transform_1, window_bounds = array<i64: 3072, 64>}, {pipeline_mode = #tpu.pipeline_mode<synchronous>, transform_indices = @transform_2, window_bounds = array<i64: 1, 64>}, {pipeline_mode = #tpu.pipeline_mode<synchronous>, transform_indices = @transform_3, window_bounds = array<i64: 64, 32>}, {pipeline_mode = #tpu.pipeline_mode<synchronous>, transform_indices = @transform_4, window_bounds = array<i64: 1, 32>}, {pipeline_mode = #tpu.pipeline_mode<synchronous>, transform_indices = @transform_5, window_bounds = array<i64: 32, 128>}, {pipeline_mode = #tpu.pipeline_mode<synchronous>, transform_indices = @transform_6, window_bounds = array<i64: 1, 128>}, {transform_indices = @transform_7, window_bounds = array<i64: 2, 128>}]} {
    %c0 = arith.constant 0 : index
    %c0_0 = arith.constant 0 : index
    %0 = vector.load %arg1[%c0, %c0_0] : memref<2x3072xf32, #tpu.memory_space<vmem>>, vector<2x3072xf32>
    %c0_1 = arith.constant 0 : index
    %c0_2 = arith.constant 0 : index
    %1 = vector.load %arg2[%c0_1, %c0_2] : memref<3072x64xf32, #tpu.memory_space<vmem>>, vector<3072x64xf32>
    %cst = arith.constant dense<0.000000e+00> : vector<2x64xf32>
    %2 = tpu.matmul %0, %1, %cst {dimension_numbers = #tpu.dot_dimension_numbers<[1], [0], [0], [1], [0, 0, 1, 1], [], []>} : vector<2x3072xf32>, vector<3072x64xf32>, vector<2x64xf32> -> vector<2x64xf32>
    %c0_3 = arith.constant 0 : index
    %c0_4 = arith.constant 0 : index
    %3 = vector.load %arg3[%c0_3, %c0_4] : memref<1x64xf32, #tpu.memory_space<vmem>>, vector<1x64xf32>
    %4 = vector.broadcast %3 : vector<1x64xf32> to vector<2x64xf32>
    %5 = arith.addf %2, %4 : vector<2x64xf32>
    %cst_5 = arith.constant 0.000000e+00 : f32
    %6 = vector.broadcast %cst_5 : f32 to vector<2x64xf32>
    %7 = arith.maximumf %5, %6 : vector<2x64xf32>
    %c0_6 = arith.constant 0 : index
    %c0_7 = arith.constant 0 : index
    %8 = vector.load %arg4[%c0_6, %c0_7] : memref<64x32xf32, #tpu.memory_space<vmem>>, vector<64x32xf32>
    %cst_8 = arith.constant dense<0.000000e+00> : vector<2x32xf32>
    %9 = tpu.matmul %7, %8, %cst_8 {dimension_numbers = #tpu.dot_dimension_numbers<[1], [0], [0], [1], [0, 0, 1, 1], [], []>} : vector<2x64xf32>, vector<64x32xf32>, vector<2x32xf32> -> vector<2x32xf32>
    %c0_9 = arith.constant 0 : index
    %c0_10 = arith.constant 0 : index
    %10 = vector.load %arg5[%c0_9, %c0_10] : memref<1x32xf32, #tpu.memory_space<vmem>>, vector<1x32xf32>
    %11 = vector.broadcast %10 : vector<1x32xf32> to vector<2x32xf32>
    %12 = arith.addf %9, %11 : vector<2x32xf32>
    %cst_11 = arith.constant 0.000000e+00 : f32
    %13 = vector.broadcast %cst_11 : f32 to vector<2x32xf32>
    %14 = arith.maximumf %12, %13 : vector<2x32xf32>
    %c0_12 = arith.constant 0 : index
    %c0_13 = arith.constant 0 : index
    %15 = vector.load %arg6[%c0_12, %c0_13] : memref<32x128xf32, #tpu.memory_space<vmem>>, vector<32x128xf32>
    %cst_14 = arith.constant dense<0.000000e+00> : vector<2x128xf32>
    %16 = tpu.matmul %14, %15, %cst_14 {dimension_numbers = #tpu.dot_dimension_numbers<[1], [0], [0], [1], [0, 0, 1, 1], [], []>} : vector<2x32xf32>, vector<32x128xf32>, vector<2x128xf32> -> vector<2x128xf32>
    %c0_15 = arith.constant 0 : index
    %c0_16 = arith.constant 0 : index
    %17 = vector.load %arg7[%c0_15, %c0_16] : memref<1x128xf32, #tpu.memory_space<vmem>>, vector<1x128xf32>
    %18 = vector.broadcast %17 : vector<1x128xf32> to vector<2x128xf32>
    %19 = arith.addf %16, %18 : vector<2x128xf32>
    %c0_17 = arith.constant 0 : index
    %c0_18 = arith.constant 0 : index
    %20 = vector.load %arg8[%c0_17, %c0_18] : memref<2x128xf32, #tpu.memory_space<vmem>>, vector<2x128xf32>
    tpu.vector_store %arg8[%c0_17, %c0_18], %19 {strides = array<i32>} : memref<2x128xf32, #tpu.memory_space<vmem>>, vector<2x128xf32>,
    return
  }
  func.func @transform_0(%arg0: i32) -> (i32, i32) {
    %c0_i32 = arith.constant 0 : i32
    %c0_i32_0 = arith.constant 0 : i32
    return %arg0, %c0_i32 : i32, i32
  }
  func.func @transform_1(%arg0: i32) -> (i32, i32) {
    %c0_i32 = arith.constant 0 : i32
    %c0_i32_0 = arith.constant 0 : i32
    %c0_i32_1 = arith.constant 0 : i32
    return %c0_i32, %c0_i32_0 : i32, i32
  }
  func.func @transform_2(%arg0: i32) -> (i32, i32) {
    %c0_i32 = arith.constant 0 : i32
    %c0_i32_0 = arith.constant 0 : i32
    %c0_i32_1 = arith.constant 0 : i32
    return %c0_i32, %c0_i32_0 : i32, i32
  }
  func.func @transform_3(%arg0: i32) -> (i32, i32) {
    %c0_i32 = arith.constant 0 : i32
    %c0_i32_0 = arith.constant 0 : i32
    %c0_i32_1 = arith.constant 0 : i32
    return %c0_i32, %c0_i32_0 : i32, i32
  }
  func.func @transform_4(%arg0: i32) -> (i32, i32) {
    %c0_i32 = arith.constant 0 : i32
    %c0_i32_0 = arith.constant 0 : i32
    %c0_i32_1 = arith.constant 0 : i32
    return %c0_i32, %c0_i32_0 : i32, i32
  }
  func.func @transform_5(%arg0: i32) -> (i32, i32) {
    %c0_i32 = arith.constant 0 : i32
    %c0_i32_0 = arith.constant 0 : i32
    %c0_i32_1 = arith.constant 0 : i32
    return %c0_i32, %c0_i32_0 : i32, i32
  }
  func.func @transform_6(%arg0: i32) -> (i32, i32) {
    %c0_i32 = arith.constant 0 : i32
    %c0_i32_0 = arith.constant 0 : i32
    %c0_i32_1 = arith.constant 0 : i32
    return %c0_i32, %c0_i32_0 : i32, i32
  }
  func.func @transform_7(%arg0: i32) -> (i32, i32) {
    %c0_i32 = arith.constant 0 : i32
    %c0_i32_0 = arith.constant 0 : i32
    return %arg0, %c0_i32 : i32, i32
  }
}

</mosaic_0001>

<bundles_post_ra>
// kernel: mlp_forward.1
= control target key start
LH: loop header
LB: loop body
LE: loop exit
PB: predicated region body
PF: predicated region fallthrough
CT: control target
= control target key end

     0   :  { %s2382_s0 = inlined_call_operand.vmem [shape: f32[2,3072], index: 0, kind: input, shape index: {}]   ;;  %s2383_s1 = inlined_call_operand.vmem [shape: f32[3072,64], index: 1, kind: input, shape index: {}]   ;;  %s2384_s2 = inlined_call_operand.vmem [shape: f32[1,64], index: 2, kind: input, shape index: {}]   ;;  %s2385_s3 = inlined_call_operand.vmem [shape: f32[64,32], index: 3, kind: input, shape index: {}]   ;;  %s2386_s4 = inlined_call_operand.vmem [shape: f32[1,32], index: 4, kind: input, shape index: {}]   ;;  %s2387_s5 = inlined_call_operand.vmem [shape: f32[32,128], index: 5, kind: input, shape index: {}]   ;;  %s2388_s6 = inlined_call_operand.vmem [shape: f32[1,128], index: 6, kind: input, shape index: {}]   ;;  %s2389_s7 = inlined_call_operand.hbm [shape: f32[2,128], index: 7, kind: output, shape index: {}]  }
   0x1   :  { %v48_v0 = vld [vmem:[%s2383_s1 + $0x78] sm:$0xff]  ;;  %v47_v2 = vld [vmem:[%s2383_s1 + $0x70] sm:$0xff]  ;;  %v46_v6 = vld [vmem:[%s2383_s1 + $0x68] sm:$0xff] }
   0x2   :  { %v80_v1 = vld [vmem:[%s2383_s1 + $0x178] sm:$0xff]  ;;  %482 = vmatpush.msra.mxu0 %v48_v0  ;;  %v79_v4 = vld [vmem:[%s2383_s1 + $0x170] sm:$0xff]  ;;  %v78_v8 = vld [vmem:[%s2383_s1 + $0x168] sm:$0xff] }
   0x3   :  { %522 = vmatpush.msra.mxu2 %v80_v1  ;;  %v64_v3 = vld [vmem:[%s2383_s1 + $0xf8] sm:$0xff]  ;;  %v63_v7 = vld [vmem:[%s2383_s1 + $0xf0] sm:$0xff]  ;;  %v62_v10 = vld [vmem:[%s2383_s1 + $0xe8] sm:$0xff] }
   0x4   :  { %v96_v5 = vld [vmem:[%s2383_s1 + $0x1f8] sm:$0xff]  ;;  %502 = vmatpush.msra.mxu1 %v64_v3  ;;  %483 = vmatpush.msra.mxu0 %v47_v2  ;;  %v95_v9 = vld [vmem:[%s2383_s1 + $0x1f0] sm:$0xff]  ;;  %v45_v11 = vld [vmem:[%s2383_s1 + $0x60] sm:$0xff] }
   0x5   :  { %542 = vmatpush.msra.mxu3 %v96_v5  ;;  %523 = vmatpush.msra.mxu2 %v79_v4  ;;  %v77_v12 = vld [vmem:[%s2383_s1 + $0x160] sm:$0xff]  ;;  %v94_v13 = vld [vmem:[%s2383_s1 + $0x1e8] sm:$0xff]  ;;  %v44_v16 = vld [vmem:[%s2383_s1 + $0x58] sm:$0xff] }
   0x6   :  { %503 = vmatpush.msra.mxu1 %v63_v7  ;;  %484 = vmatpush.msra.mxu0 %v46_v6  ;;  %v61_v14 = vld [vmem:[%s2383_s1 + $0xe0] sm:$0xff]  ;;  %v76_v17 = vld [vmem:[%s2383_s1 + $0x158] sm:$0xff]  ;;  %v43_v20 = vld [vmem:[%s2383_s1 + $0x50] sm:$0xff] }
   0x7   :  { %543 = vmatpush.msra.mxu3 %v95_v9  ;;  %524 = vmatpush.msra.mxu2 %v78_v8  ;;  %v93_v15 = vld [vmem:[%s2383_s1 + $0x1e0] sm:$0xff]  ;;  %v60_v18 = vld [vmem:[%s2383_s1 + $0xd8] sm:$0xff]  ;;  %v75_v21 = vld [vmem:[%s2383_s1 + $0x150] sm:$0xff] }
   0x8   :  { %504 = vmatpush.msra.mxu1 %v62_v10  ;;  %485 = vmatpush.msra.mxu0 %v45_v11  ;;  %v92_v19 = vld [vmem:[%s2383_s1 + $0x1d8] sm:$0xff]  ;;  %v59_v22 = vld [vmem:[%s2383_s1 + $0xd0] sm:$0xff]  ;;  %v42_v24 = vld [vmem:[%s2383_s1 + $0x48] sm:$0xff] }
   0x9   :  { %544 = vmatpush.msra.mxu3 %v94_v13  ;;  %525 = vmatpush.msra.mxu2 %v77_v12  ;;  %v91_v23 = vld [vmem:[%s2383_s1 + $0x1d0] sm:$0xff]  ;;  %v74_v25 = vld [vmem:[%s2383_s1 + $0x148] sm:$0xff]  ;;  %v41_v28 = vld [vmem:[%s2383_s1 + $0x40] sm:$0xff] }
   0xa   :  { %505 = vmatpush.msra.mxu1 %v61_v14  ;;  %486 = vmatpush.msra.mxu0 %v44_v16  ;;  %v58_v26 = vld [vmem:[%s2383_s1 + $0xc8] sm:$0xff]  ;;  %v73_v29 = vld [vmem:[%s2383_s1 + $0x140] sm:$0xff]  ;;  %v40_v32 = vld [vmem:[%s2383_s1 + $0x38] sm:$0xff] }
   0xb   :  { %545 = vmatpush.msra.mxu3 %v93_v15  ;;  %526 = vmatpush.msra.mxu2 %v76_v17  ;;  %v90_v27 = vld [vmem:[%s2383_s1 + $0x1c8] sm:$0xff]  ;;  %v57_v30 = vld [vmem:[%s2383_s1 + $0xc0] sm:$0xff]  ;;  %v72_v33 = vld [vmem:[%s2383_s1 + $0x138] sm:$0xff] }
   0xc   :  { %506 = vmatpush.msra.mxu1 %v60_v18  ;;  %487 = vmatpush.msra.mxu0 %v43_v20  ;;  %v89_v31 = vld [vmem:[%s2383_s1 + $0x1c0] sm:$0xff]  ;;  %v56_v34 = vld [vmem:[%s2383_s1 + $0xb8] sm:$0xff]  ;;  %v39_v36 = vld [vmem:[%s2383_s1 + $0x30] sm:$0xff] }
   0xd   :  { %546 = vmatpush.msra.mxu3 %v92_v19  ;;  %527 = vmatpush.msra.mxu2 %v75_v21  ;;  %v88_v35 = vld [vmem:[%s2383_s1 + $0x1b8] sm:$0xff]  ;;  %v71_v37 = vld [vmem:[%s2383_s1 + $0x130] sm:$0xff]  ;;  %v38_v40 = vld [vmem:[%s2383_s1 + $0x28] sm:$0xff] }
   0xe   :  { %507 = vmatpush.msra.mxu1 %v59_v22  ;;  %488 = vmatpush.msra.mxu0 %v42_v24  ;;  %v55_v38 = vld [vmem:[%s2383_s1 + $0xb0] sm:$0xff]  ;;  %v70_v41 = vld [vmem:[%s2383_s1 + $0x128] sm:$0xff]  ;;  %v37_v44 = vld [vmem:[%s2383_s1 + $0x20] sm:$0xff] }
   0xf   :  { %547 = vmatpush.msra.mxu3 %v91_v23  ;;  %528 = vmatpush.msra.mxu2 %v74_v25  ;;  %v87_v39 = vld [vmem:[%s2383_s1 + $0x1b0] sm:$0xff]  ;;  %v54_v42 = vld [vmem:[%s2383_s1 + $0xa8] sm:$0xff]  ;;  %v69_v45 = vld [vmem:[%s2383_s1 + $0x120] sm:$0xff] }
  0x10   :  { %508 = vmatpush.msra.mxu1 %v58_v26  ;;  %489 = vmatpush.msra.mxu0 %v41_v28  ;;  %v86_v43 = vld [vmem:[%s2383_s1 + $0x1a8] sm:$0xff]  ;;  %v53_v46 = vld [vmem:[%s2383_s1 + $0xa0] sm:$0xff]  ;;  %v36_v48 = vld [vmem:[%s2383_s1 + $0x18] sm:$0xff] }
  0x11   :  { %548 = vmatpush.msra.mxu3 %v90_v27  ;;  %529 = vmatpush.msra.mxu2 %v73_v29  ;;  %v85_v47 = vld [vmem:[%s2383_s1 + $0x1a0] sm:$0xff]  ;;  %v68_v49 = vld [vmem:[%s2383_s1 + $0x118] sm:$0xff]  ;;  %v35_v52 = vld [vmem:[%s2383_s1 + $0x10] sm:$0xff] }
  0x12   :  { %509 = vmatpush.msra.mxu1 %v57_v30  ;;  %490 = vmatpush.msra.mxu0 %v40_v32  ;;  %v52_v50 = vld [vmem:[%s2383_s1 + $0x98] sm:$0xff]  ;;  %v67_v53 = vld [vmem:[%s2383_s1 + $0x110] sm:$0xff]  ;;  %v34_v56 = vld [vmem:[%s2383_s1 + $0x8] sm:$0xff] }
  0x13   :  { %549 = vmatpush.msra.mxu3 %v89_v31  ;;  %530 = vmatpush.msra.mxu2 %v72_v33  ;;  %v84_v51 = vld [vmem:[%s2383_s1 + $0x198] sm:$0xff]  ;;  %v51_v54 = vld [vmem:[%s2383_s1 + $0x90] sm:$0xff]  ;;  %v66_v57 = vld [vmem:[%s2383_s1 + $0x108] sm:$0xff] }
  0x14   :  { %510 = vmatpush.msra.mxu1 %v56_v34  ;;  %491 = vmatpush.msra.mxu0 %v39_v36  ;;  %v83_v55 = vld [vmem:[%s2383_s1 + $0x190] sm:$0xff]  ;;  %v50_v58 = vld [vmem:[%s2383_s1 + $0x88] sm:$0xff]  ;;  %v33_v60 = vld [vmem:[%s2383_s1] sm:$0xff] }
  0x15   :  { %550 = vmatpush.msra.mxu3 %v88_v35  ;;  %531 = vmatpush.msra.mxu2 %v71_v37  ;;  %v82_v59 = vld [vmem:[%s2383_s1 + $0x188] sm:$0xff]  ;;  %v65_v61 = vld [vmem:[%s2383_s1 + $0x100] sm:$0xff]  ;;  %v112_v62 = vld [vmem:[%s2383_s1 + $0x278] sm:$0xff] }
  0x16   :  { %511 = vmatpush.msra.mxu1 %v55_v38  ;;  %492 = vmatpush.msra.mxu0 %v38_v40  ;;  %v144_v63 = vld [vmem:[%s2383_s1 + $0x378] sm:$0xff]  ;;  %v49_v0 = vld [vmem:[%s2383_s1 + $0x80] sm:$0xff]  ;;  %v111_v2 = vld [vmem:[%s2383_s1 + $0x270] sm:$0xff] }
  0x17   :  { %551 = vmatpush.msra.mxu3 %v87_v39  ;;  %532 = vmatpush.msra.mxu2 %v70_v41  ;;  %v81_v1 = vld [vmem:[%s2383_s1 + $0x180] sm:$0xff]  ;;  %v128_v3 = vld [vmem:[%s2383_s1 + $0x2f8] sm:$0xff]  ;;  %v143_v4 = vld [vmem:[%s2383_s1 + $0x370] sm:$0xff] }
  0x18   :  { %512 = vmatpush.msra.mxu1 %v54_v42  ;;  %493 = vmatpush.msra.mxu0 %v37_v44  ;;  %v160_v5 = vld [vmem:[%s2383_s1 + $0x3f8] sm:$0xff]  ;;  %v110_v6 = vld [vmem:[%s2383_s1 + $0x268] sm:$0xff]  ;;  %v127_v7 = vld [vmem:[%s2383_s1 + $0x2f0] sm:$0xff] }
  0x19   :  { %552 = vmatpush.msra.mxu3 %v86_v43  ;;  %533 = vmatpush.msra.mxu2 %v69_v45  ;;  %v142_v8 = vld [vmem:[%s2383_s1 + $0x368] sm:$0xff]  ;;  %v159_v9 = vld [vmem:[%s2383_s1 + $0x3f0] sm:$0xff]  ;;  %v109_v10 = vld [vmem:[%s2383_s1 + $0x260] sm:$0xff] }
  0x1a   :  { %513 = vmatpush.msra.mxu1 %v53_v46  ;;  %494 = vmatpush.msra.mxu0 %v36_v48  ;;  %v126_v11 = vld [vmem:[%s2383_s1 + $0x2e8] sm:$0xff]  ;;  %v141_v12 = vld [vmem:[%s2383_s1 + $0x360] sm:$0xff]  ;;  %v108_v14 = vld [vmem:[%s2383_s1 + $0x258] sm:$0xff] }
  0x1b   :  { %553 = vmatpush.msra.mxu3 %v85_v47  ;;  %534 = vmatpush.msra.mxu2 %v68_v49  ;;  %v158_v13 = vld [vmem:[%s2383_s1 + $0x3e8] sm:$0xff]  ;;  %v125_v15 = vld [vmem:[%s2383_s1 + $0x2e0] sm:$0xff]  ;;  %v140_v16 = vld [vmem:[%s2383_s1 + $0x358] sm:$0xff] }
  0x1c   :  { %514 = vmatpush.msra.mxu1 %v52_v50  ;;  %495 = vmatpush.msra.mxu0 %v35_v52  ;;  %v157_v17 = vld [vmem:[%s2383_s1 + $0x3e0] sm:$0xff]  ;;  %v107_v18 = vld [vmem:[%s2383_s1 + $0x250] sm:$0xff]  ;;  %v124_v19 = vld [vmem:[%s2383_s1 + $0x2d8] sm:$0xff] }
  0x1d   :  { %554 = vmatpush.msra.mxu3 %v84_v51  ;;  %535 = vmatpush.msra.mxu2 %v67_v53  ;;  %v139_v20 = vld [vmem:[%s2383_s1 + $0x350] sm:$0xff]  ;;  %v156_v21 = vld [vmem:[%s2383_s1 + $0x3d8] sm:$0xff]  ;;  %v106_v22 = vld [vmem:[%s2383_s1 + $0x248] sm:$0xff] }
  0x1e   :  { %515 = vmatpush.msra.mxu1 %v51_v54  ;;  %496 = vmatpush.msra.mxu0 %v34_v56  ;;  %v123_v23 = vld [vmem:[%s2383_s1 + $0x2d0] sm:$0xff]  ;;  %v138_v24 = vld [vmem:[%s2383_s1 + $0x348] sm:$0xff]  ;;  %v27_v26 = vld [vmem:[%s2382_s0] sm:$0xff] }
  0x1f   :  { %555 = vmatpush.msra.mxu3 %v83_v55  ;;  %536 = vmatpush.msra.mxu2 %v66_v57  ;;  %v155_v25 = vld [vmem:[%s2383_s1 + $0x3d0] sm:$0xff]  ;;  %v105_v27 = vld [vmem:[%s2383_s1 + $0x240] sm:$0xff]  ;;  %v122_v28 = vld [vmem:[%s2383_s1 + $0x2c8] sm:$0xff]  ;;  %427 = vst [vmem:[#allocation1] ss:$4 sm:$0xff] %v27_v26 }
  0x20   :  { %516 = vmatpush.msra.mxu1 %v50_v58  ;;  %497 = vmatpush.msra.mxu0 %v33_v60  ;;  %v137_v29 = vld [vmem:[%s2383_s1 + $0x340] sm:$0xff]  ;;  %v154_v30 = vld [vmem:[%s2383_s1 + $0x3c8] sm:$0xff]  ;;  %v104_v31 = vld [vmem:[%s2383_s1 + $0x238] sm:$0xff] }
  0x21   :  { %556 = vmatpush.msra.mxu3 %v82_v59  ;;  %537 = vmatpush.msra.mxu2 %v65_v61  ;;  %v121_v32 = vld [vmem:[%s2383_s1 + $0x2c0] sm:$0xff]  ;;  %v136_v33 = vld [vmem:[%s2383_s1 + $0x338] sm:$0xff]  ;;  %v103_v35 = vld [vmem:[%s2383_s1 + $0x230] sm:$0xff] }
  0x22   :  { %562 = vmatpush.msrb.mxu0 %v112_v62  ;;  %517 = vmatpush.msra.mxu1 %v49_v0  ;;  %v153_v34 = vld [vmem:[%s2383_s1 + $0x3c0] sm:$0xff]  ;;  %v120_v36 = vld [vmem:[%s2383_s1 + $0x2b8] sm:$0xff]  ;;  %v135_v37 = vld [vmem:[%s2383_s1 + $0x330] sm:$0xff] }
  0x23   :  { %602 = vmatpush.msrb.mxu2 %v144_v63  ;;  %557 = vmatpush.msra.mxu3 %v81_v1  ;;  %v152_v38 = vld [vmem:[%s2383_s1 + $0x3b8] sm:$0xff]  ;;  %v102_v39 = vld [vmem:[%s2383_s1 + $0x228] sm:$0xff]  ;;  %v119_v40 = vld [vmem:[%s2383_s1 + $0x2b0] sm:$0xff] }
  0x24   :  { %563 = vmatpush.msrb.mxu0 %v111_v2  ;;  %582 = vmatpush.msrb.mxu1 %v128_v3  ;;  %v134_v41 = vld [vmem:[%s2383_s1 + $0x328] sm:$0xff]  ;;  %v151_v42 = vld [vmem:[%s2383_s1 + $0x3b0] sm:$0xff]  ;;  %v101_v44 = vld [vmem:[%s2383_s1 + $0x220] sm:$0xff] }
  0x25   :  { %603 = vmatpush.msrb.mxu2 %v143_v4  ;;  %622 = vmatpush.msrb.mxu3 %v160_v5  ;;  %v28_v43 = vld [vmem:[%s2382_s0 + $0x8] sm:$0xff]  ;;  %v29_v46 = vld [vmem:[%s2382_s0 + $0x10] sm:$0xff]  ;;  %v133_v47 = vld [vmem:[%s2383_s1 + $0x320] sm:$0xff] }
  0x26   :  { %564 = vmatpush.msrb.mxu0 %v110_v6  ;;  %583 = vmatpush.msrb.mxu1 %v127_v7  ;;  %v118_v45 = vld [vmem:[%s2383_s1 + $0x2a8] sm:$0xff]  ;;  %429 = vst [vmem:[#allocation1 + $0x20] ss:$4 sm:$0xff] %v28_v43  ;;  %v430_v48 = vld.sshfl [vmem:[#allocation1] sm:$0xff pattern:$0x73625140] }
  0x27   :  { %604 = vmatpush.msrb.mxu2 %v142_v8  ;;  %623 = vmatpush.msrb.mxu3 %v159_v9  ;;  %v432_v49 = vld.sshfl [vmem:[#allocation1 + $0x10] sm:$0xff pattern:$0x73625140]  ;;  %v1458_v50 = vld.sshfl [vmem:[#allocation1 + $0x8] sm:$0xff pattern:$0x73625140] }
  0x28   :  { %565 = vmatpush.msrb.mxu0 %v109_v10  ;;  %584 = vmatpush.msrb.mxu1 %v126_v11  ;;  %v1460_v51 = vld.sshfl [vmem:[#allocation1 + $0x18] sm:$0xff pattern:$0x73625140]  ;;  %v150_v52 = vld [vmem:[%s2383_s1 + $0x3a8] sm:$0xff]  ;;  %v117_v54 = vld [vmem:[%s2383_s1 + $0x2a0] sm:$0xff] }
  0x29   :  { %605 = vmatpush.msrb.mxu2 %v141_v12  ;;  %624 = vmatpush.msrb.mxu3 %v158_v13  ;;  %v100_v53 = vld [vmem:[%s2383_s1 + $0x218] sm:$0xff]  ;;  %438 = vst [vmem:[#allocation1] ss:$4 sm:$0xff] %v29_v46  ;;  %v149_v56 = vld [vmem:[%s2383_s1 + $0x3a0] sm:$0xff]  ;;  %v99_v57 = vld [vmem:[%s2383_s1 + $0x210] sm:$0xff] }
  0x2a   :  { %566 = vmatpush.msrb.mxu0 %v108_v14  ;;  %585 = vmatpush.msrb.mxu1 %v125_v15  ;;  %v132_v55 = vld [vmem:[%s2383_s1 + $0x318] sm:$0xff]  ;;  %v131_v59 = vld [vmem:[%s2383_s1 + $0x310] sm:$0xff]  ;;  %v98_v61 = vld [vmem:[%s2383_s1 + $0x208] sm:$0xff] }
  0x2b   :  { %606 = vmatpush.msrb.mxu2 %v140_v16  ;;  %625 = vmatpush.msrb.mxu3 %v157_v17  ;;  %v116_v58 = vld [vmem:[%s2383_s1 + $0x298] sm:$0xff]  ;;  %v115_v62 = vld [vmem:[%s2383_s1 + $0x290] sm:$0xff]  ;;  %v130_v4 = vld [vmem:[%s2383_s1 + $0x308] sm:$0xff] }
  0x2c   :  { %567 = vmatpush.msrb.mxu0 %v107_v18  ;;  %586 = vmatpush.msrb.mxu1 %v124_v19  ;;  %v148_v60 = vld [vmem:[%s2383_s1 + $0x398] sm:$0xff]  ;;  %v147_v5 = vld [vmem:[%s2383_s1 + $0x390] sm:$0xff]  ;;  %v97_v6 = vld [vmem:[%s2383_s1 + $0x200] sm:$0xff] }
  0x2d   :  { %607 = vmatpush.msrb.mxu2 %v139_v20  ;;  %626 = vmatpush.msrb.mxu3 %v156_v21  ;;  %v30_v63 = vld [vmem:[%s2382_s0 + $0x18] sm:$0xff]  ;;  %v1498_v0 = vld.sshfl [vmem:[#allocation1 + $0x30] sm:$0xff pattern:$0x73625140]  ;;  %v114_v7 = vld [vmem:[%s2383_s1 + $0x288] sm:$0xff] }
  0x2e   :  { %568 = vmatpush.msrb.mxu0 %v106_v22  ;;  %587 = vmatpush.msrb.mxu1 %v123_v23  ;;  %v1500_v1 = vld.sshfl [vmem:[#allocation1 + $0x20] sm:$0xff pattern:$0x73625140]  ;;  %v1502_v2 = vld.sshfl [vmem:[#allocation1 + $0x38] sm:$0xff pattern:$0x73625140] }
  0x2f   :  { %608 = vmatpush.msrb.mxu2 %v138_v24  ;;  %627 = vmatpush.msrb.mxu3 %v155_v25  ;;  %v1504_v3 = vld.sshfl [vmem:[#allocation1 + $0x28] sm:$0xff pattern:$0x73625140]  ;;  %v129_v8 = vld [vmem:[%s2383_s1 + $0x300] sm:$0xff]  ;;  %v176_v10 = vld [vmem:[%s2383_s1 + $0x478] sm:$0xff] }
  0x30   :  { %569 = vmatpush.msrb.mxu0 %v105_v27  ;;  %588 = vmatpush.msrb.mxu1 %v122_v28  ;;  %439 = vst [vmem:[#allocation1 + $0x20] ss:$4 sm:$0xff] %v30_v63  ;;  %v146_v9 = vld [vmem:[%s2383_s1 + $0x388] sm:$0xff]  ;;  %v208_v11 = vld [vmem:[%s2383_s1 + $0x578] sm:$0xff]  ;;  %v113_v12 = vld [vmem:[%s2383_s1 + $0x280] sm:$0xff] }
  0x31   :  { %609 = vmatpush.msrb.mxu2 %v137_v29  ;;  %628 = vmatpush.msrb.mxu3 %v154_v30  ;;  %v145_v13 = vld [vmem:[%s2383_s1 + $0x380] sm:$0xff]  ;;  %v175_v14 = vld [vmem:[%s2383_s1 + $0x470] sm:$0xff]  ;;  %v192_v15 = vld [vmem:[%s2383_s1 + $0x4f8] sm:$0xff] }
  0x32   :  { %570 = vmatpush.msrb.mxu0 %v104_v31  ;;  %589 = vmatpush.msrb.mxu1 %v121_v32  ;;  %v207_v16 = vld [vmem:[%s2383_s1 + $0x570] sm:$0xff]  ;;  %v224_v17 = vld [vmem:[%s2383_s1 + $0x5f8] sm:$0xff]  ;;  %v174_v18 = vld [vmem:[%s2383_s1 + $0x468] sm:$0xff] }
  0x33   :  { %610 = vmatpush.msrb.mxu2 %v136_v33  ;;  %629 = vmatpush.msrb.mxu3 %v153_v34  ;;  %v191_v19 = vld [vmem:[%s2383_s1 + $0x4f0] sm:$0xff]  ;;  %v206_v20 = vld [vmem:[%s2383_s1 + $0x568] sm:$0xff]  ;;  %v173_v22 = vld [vmem:[%s2383_s1 + $0x460] sm:$0xff] }
  0x34   :  { %571 = vmatpush.msrb.mxu0 %v103_v35  ;;  %590 = vmatpush.msrb.mxu1 %v120_v36  ;;  %v223_v21 = vld [vmem:[%s2383_s1 + $0x5f0] sm:$0xff]  ;;  %v190_v23 = vld [vmem:[%s2383_s1 + $0x4e8] sm:$0xff]  ;;  %v205_v24 = vld [vmem:[%s2383_s1 + $0x560] sm:$0xff] }
  0x35   :  { %611 = vmatpush.msrb.mxu2 %v135_v37  ;;  %630 = vmatpush.msrb.mxu3 %v152_v38  ;;  %v222_v25 = vld [vmem:[%s2383_s1 + $0x5e8] sm:$0xff]  ;;  %v1574_v26 = vld.sshfl [vmem:[#allocation1] sm:$0xff pattern:$0x73625140]  ;;  %v172_v29 = vld [vmem:[%s2383_s1 + $0x458] sm:$0xff] }
  0x36   :  { %572 = vmatpush.msrb.mxu0 %v102_v39  ;;  %591 = vmatpush.msrb.mxu1 %v119_v40  ;;  %v1576_v27 = vld.sshfl [vmem:[#allocation1 + $0x10] sm:$0xff pattern:$0x73625140]  ;;  %v1578_v28 = vld.sshfl [vmem:[#allocation1 + $0x8] sm:$0xff pattern:$0x73625140] }
  0x37   :  { %612 = vmatpush.msrb.mxu2 %v134_v41  ;;  %631 = vmatpush.msrb.mxu3 %v151_v42  ;;  %v31_v30 = vld [vmem:[%s2382_s0 + $0x20] sm:$0xff]  ;;  %v1586_v31 = vld.sshfl [vmem:[#allocation1 + $0x18] sm:$0xff pattern:$0x73625140]  ;;  %v171_v35 = vld [vmem:[%s2383_s1 + $0x450] sm:$0xff] }
  0x38   :  { %573 = vmatpush.msrb.mxu0 %v101_v44  ;;  %592 = vmatpush.msrb.mxu1 %v118_v45  ;;  %v189_v32 = vld [vmem:[%s2383_s1 + $0x4e0] sm:$0xff]  ;;  %v204_v33 = vld [vmem:[%s2383_s1 + $0x558] sm:$0xff]  ;;  %448 = vst [vmem:[#allocation1] ss:$4 sm:$0xff] %v31_v30  ;;  %v203_v37 = vld [vmem:[%s2383_s1 + $0x550] sm:$0xff] }
  0x39   :  { %613 = vmatpush.msrb.mxu2 %v133_v47  ;;  %632 = vmatpush.msrb.mxu3 %v150_v52  ;;  %v221_v34 = vld [vmem:[%s2383_s1 + $0x5e0] sm:$0xff]  ;;  %v188_v36 = vld [vmem:[%s2383_s1 + $0x4d8] sm:$0xff] }
  0x3a   :  { %574 = vmatpush.msrb.mxu0 %v100_v53  ;;  %593 = vmatpush.msrb.mxu1 %v117_v54 }
  0x3b   :  { %614 = vmatpush.msrb.mxu2 %v132_v55  ;;  %633 = vmatpush.msrb.mxu3 %v149_v56 }
  0x3c   :  { %575 = vmatpush.msrb.mxu0 %v99_v57  ;;  %594 = vmatpush.msrb.mxu1 %v116_v58 }
  0x3d   :  { %615 = vmatpush.msrb.mxu2 %v131_v59  ;;  %634 = vmatpush.msrb.mxu3 %v148_v60 }
  0x3e   :  { %576 = vmatpush.msrb.mxu0 %v98_v61  ;;  %595 = vmatpush.msrb.mxu1 %v115_v62 }
  0x3f   :  { %616 = vmatpush.msrb.mxu2 %v130_v4  ;;  %635 = vmatpush.msrb.mxu3 %v147_v5 }
  0x40   :  { %577 = vmatpush.msrb.mxu0 %v97_v6  ;;  %596 = vmatpush.msrb.mxu1 %v114_v7 }
  0x41   :  { %617 = vmatpush.msrb.mxu2 %v129_v8  ;;  %636 = vmatpush.msrb.mxu3 %v146_v9 }
  0x42   :  { %498 = vmatmul.f32.vlgmr.msra.gmra.mxu0 %v430_v48  ;;  %538 = vmatmul.f32.vlgmr.msra.gmra.mxu2 %v432_v49 }
  0x43   :  { %642 = vmatpush.msra.mxu0 %v176_v10  ;;  %682 = vmatpush.msra.mxu2 %v208_v11 }
  0x44   :  { %597 = vmatpush.msrb.mxu1 %v113_v12  ;;  %637 = vmatpush.msrb.mxu3 %v145_v13 }
  0x45   :  { %518 = vmatmul.f32.vlgmr.msra.gmra.mxu1 %v1458_v50  ;;  %558 = vmatmul.f32.vlgmr.msra.gmra.mxu3 %v1460_v51 }
  0x46   :  { %643 = vmatpush.msra.mxu0 %v175_v14  ;;  %662 = vmatpush.msra.mxu1 %v192_v15 }
  0x47   :  { %683 = vmatpush.msra.mxu2 %v207_v16  ;;  %702 = vmatpush.msra.mxu3 %v224_v17 }
  0x48   :  { %644 = vmatpush.msra.mxu0 %v174_v18  ;;  %663 = vmatpush.msra.mxu1 %v191_v19 }
  0x49   :  { %684 = vmatpush.msra.mxu2 %v206_v20  ;;  %703 = vmatpush.msra.mxu3 %v223_v21 }
  0x4a   :  { %645 = vmatpush.msra.mxu0 %v173_v22  ;;  %664 = vmatpush.msra.mxu1 %v190_v23 }
  0x4b   :  { %685 = vmatpush.msra.mxu2 %v205_v24  ;;  %704 = vmatpush.msra.mxu3 %v222_v25 }
  0x4c   :  { %618 = vmatmul.f32.vlgmr.msrb.gmra.mxu2 %v1498_v0  ;;  %646 = vmatpush.msra.mxu0 %v172_v29 }
  0x4d   :  { %665 = vmatpush.msra.mxu1 %v189_v32  ;;  %686 = vmatpush.msra.mxu2 %v204_v33 }
  0x4e   :  { %12 = vsyncpa [#allocation3], 0  ;;  %705 = vmatpush.msra.mxu3 %v221_v34  ;;  %578 = vmatmul.f32.vlgmr.msrb.gmra.mxu0 %v1500_v1  ;;  %v220_v38 = vld [vmem:[%s2383_s1 + $0x5d8] sm:$0xff]  ;;  %v170_v39 = vld [vmem:[%s2383_s1 + $0x448] sm:$0xff]  ;;  %vm975_vm0 = vcmask 523264   ;;  %vm1008_vm1 = vcmask 261120  }
  0x4f   :  { %638 = vmatmul.f32.vlgmr.msrb.gmra.mxu3 %v1502_v2  ;;  %647 = vmatpush.msra.mxu0 %v171_v35  ;;  %v187_v40 = vld [vmem:[%s2383_s1 + $0x4d0] sm:$0xff]  ;;  %v202_v41 = vld [vmem:[%s2383_s1 + $0x548] sm:$0xff]  ;;  %v169_v43 = vld [vmem:[%s2383_s1 + $0x440] sm:$0xff]  ;;  %s1081_s9 = smov [#allocation2]  }
  0x50   :  { %666 = vmatpush.msra.mxu1 %v188_v36  ;;  %687 = vmatpush.msra.mxu2 %v203_v37  ;;  %v219_v42 = vld [vmem:[%s2383_s1 + $0x5d0] sm:$0xff]  ;;  %v186_v44 = vld [vmem:[%s2383_s1 + $0x4c8] sm:$0xff]  ;;  %v201_v45 = vld [vmem:[%s2383_s1 + $0x540] sm:$0xff] }
  0x51   :  { %706 = vmatpush.msra.mxu3 %v220_v38  ;;  %598 = vmatmul.f32.vlgmr.msrb.gmra.mxu1 %v1504_v3  ;;  %v218_v46 = vld [vmem:[%s2383_s1 + $0x5c8] sm:$0xff]  ;;  %v168_v47 = vld [vmem:[%s2383_s1 + $0x438] sm:$0xff]  ;;  %v185_v48 = vld [vmem:[%s2383_s1 + $0x4c0] sm:$0xff] }
  0x52   :  { %648 = vmatpush.msra.mxu0 %v170_v39  ;;  %667 = vmatpush.msra.mxu1 %v187_v40  ;;  %v200_v49 = vld [vmem:[%s2383_s1 + $0x538] sm:$0xff]  ;;  %v217_v50 = vld [vmem:[%s2383_s1 + $0x5c0] sm:$0xff]  ;;  %v167_v51 = vld [vmem:[%s2383_s1 + $0x430] sm:$0xff] }
  0x53   :  { %688 = vmatpush.msra.mxu2 %v202_v41  ;;  %707 = vmatpush.msra.mxu3 %v219_v42  ;;  %v184_v52 = vld [vmem:[%s2383_s1 + $0x4b8] sm:$0xff]  ;;  %v199_v53 = vld [vmem:[%s2383_s1 + $0x530] sm:$0xff]  ;;  %v166_v55 = vld [vmem:[%s2383_s1 + $0x428] sm:$0xff] }
  0x54   :  { %649 = vmatpush.msra.mxu0 %v169_v43  ;;  %668 = vmatpush.msra.mxu1 %v186_v44  ;;  %v216_v54 = vld [vmem:[%s2383_s1 + $0x5b8] sm:$0xff]  ;;  %v183_v56 = vld [vmem:[%s2383_s1 + $0x4b0] sm:$0xff]  ;;  %v198_v57 = vld [vmem:[%s2383_s1 + $0x528] sm:$0xff] }
  0x55   :  { %689 = vmatpush.msra.mxu2 %v201_v45  ;;  %708 = vmatpush.msra.mxu3 %v218_v46  ;;  %v215_v58 = vld [vmem:[%s2383_s1 + $0x5b0] sm:$0xff]  ;;  %v165_v59 = vld [vmem:[%s2383_s1 + $0x420] sm:$0xff]  ;;  %v182_v60 = vld [vmem:[%s2383_s1 + $0x4a8] sm:$0xff] }
  0x56   :  { %650 = vmatpush.msra.mxu0 %v168_v47  ;;  %669 = vmatpush.msra.mxu1 %v185_v48  ;;  %v197_v61 = vld [vmem:[%s2383_s1 + $0x520] sm:$0xff]  ;;  %v214_v62 = vld [vmem:[%s2383_s1 + $0x5a8] sm:$0xff]  ;;  %v164_v63 = vld [vmem:[%s2383_s1 + $0x418] sm:$0xff] }
  0x57   :  { %690 = vmatpush.msra.mxu2 %v200_v49  ;;  %709 = vmatpush.msra.mxu3 %v217_v50  ;;  %v181_v0 = vld [vmem:[%s2383_s1 + $0x4a0] sm:$0xff]  ;;  %v196_v1 = vld [vmem:[%s2383_s1 + $0x518] sm:$0xff]  ;;  %v163_v3 = vld [vmem:[%s2383_s1 + $0x410] sm:$0xff] }
  0x58   :  { %651 = vmatpush.msra.mxu0 %v167_v51  ;;  %670 = vmatpush.msra.mxu1 %v184_v52  ;;  %v213_v2 = vld [vmem:[%s2383_s1 + $0x5a0] sm:$0xff]  ;;  %v180_v4 = vld [vmem:[%s2383_s1 + $0x498] sm:$0xff]  ;;  %v195_v5 = vld [vmem:[%s2383_s1 + $0x510] sm:$0xff] }
  0x59   :  { %691 = vmatpush.msra.mxu2 %v199_v53  ;;  %710 = vmatpush.msra.mxu3 %v216_v54  ;;  %v212_v6 = vld [vmem:[%s2383_s1 + $0x598] sm:$0xff]  ;;  %v162_v7 = vld [vmem:[%s2383_s1 + $0x408] sm:$0xff]  ;;  %v179_v8 = vld [vmem:[%s2383_s1 + $0x490] sm:$0xff] }
  0x5a   :  { %652 = vmatpush.msra.mxu0 %v166_v55  ;;  %671 = vmatpush.msra.mxu1 %v183_v56  ;;  %v194_v9 = vld [vmem:[%s2383_s1 + $0x508] sm:$0xff]  ;;  %v211_v10 = vld [vmem:[%s2383_s1 + $0x590] sm:$0xff]  ;;  %v161_v11 = vld [vmem:[%s2383_s1 + $0x400] sm:$0xff] }
  0x5b   :  { %692 = vmatpush.msra.mxu2 %v198_v57  ;;  %711 = vmatpush.msra.mxu3 %v215_v58  ;;  %v178_v12 = vld [vmem:[%s2383_s1 + $0x488] sm:$0xff]  ;;  %v193_v13 = vld [vmem:[%s2383_s1 + $0x500] sm:$0xff]  ;;  %v240_v15 = vld [vmem:[%s2383_s1 + $0x678] sm:$0xff] }
  0x5c   :  { %653 = vmatpush.msra.mxu0 %v165_v59  ;;  %672 = vmatpush.msra.mxu1 %v182_v60  ;;  %v210_v14 = vld [vmem:[%s2383_s1 + $0x588] sm:$0xff]  ;;  %v272_v16 = vld [vmem:[%s2383_s1 + $0x778] sm:$0xff]  ;;  %v177_v17 = vld [vmem:[%s2383_s1 + $0x480] sm:$0xff] }
  0x5d   :  { %693 = vmatpush.msra.mxu2 %v197_v61  ;;  %712 = vmatpush.msra.mxu3 %v214_v62  ;;  %v209_v18 = vld [vmem:[%s2383_s1 + $0x580] sm:$0xff]  ;;  %v239_v19 = vld [vmem:[%s2383_s1 + $0x670] sm:$0xff]  ;;  %v256_v20 = vld [vmem:[%s2383_s1 + $0x6f8] sm:$0xff] }
  0x5e   :  { %654 = vmatpush.msra.mxu0 %v164_v63  ;;  %673 = vmatpush.msra.mxu1 %v181_v0  ;;  %v271_v21 = vld [vmem:[%s2383_s1 + $0x770] sm:$0xff]  ;;  %v288_v22 = vld [vmem:[%s2383_s1 + $0x7f8] sm:$0xff]  ;;  %v238_v23 = vld [vmem:[%s2383_s1 + $0x668] sm:$0xff] }
  0x5f   :  { %694 = vmatpush.msra.mxu2 %v196_v1  ;;  %713 = vmatpush.msra.mxu3 %v213_v2  ;;  %v255_v24 = vld [vmem:[%s2383_s1 + $0x6f0] sm:$0xff]  ;;  %v270_v25 = vld [vmem:[%s2383_s1 + $0x768] sm:$0xff]  ;;  %v1776_v29 = vld.sshfl [vmem:[#allocation1 + $0x20] sm:$0xff pattern:$0x73625140] }
  0x60   :  { %655 = vmatpush.msra.mxu0 %v163_v3  ;;  %674 = vmatpush.msra.mxu1 %v180_v4  ;;  %v1778_v30 = vld.sshfl [vmem:[#allocation1 + $0x30] sm:$0xff pattern:$0x73625140]  ;;  %v1780_v32 = vld.sshfl [vmem:[#allocation1 + $0x28] sm:$0xff pattern:$0x73625140] }
  0x61   :  { %695 = vmatpush.msra.mxu2 %v195_v5  ;;  %714 = vmatpush.msra.mxu3 %v212_v6  ;;  %v1788_v33 = vld.sshfl [vmem:[#allocation1 + $0x38] sm:$0xff pattern:$0x73625140]  ;;  %v269_v34 = vld [vmem:[%s2383_s1 + $0x760] sm:$0xff]  ;;  %v286_v35 = vld [vmem:[%s2383_s1 + $0x7e8] sm:$0xff] }
  0x62   :  { %656 = vmatpush.msra.mxu0 %v162_v7  ;;  %675 = vmatpush.msra.mxu1 %v179_v8  ;;  %v236_v36 = vld [vmem:[%s2383_s1 + $0x658] sm:$0xff]  ;;  %v253_v37 = vld [vmem:[%s2383_s1 + $0x6e0] sm:$0xff]  ;;  %v235_v40 = vld [vmem:[%s2383_s1 + $0x650] sm:$0xff] }
  0x63   :  { %696 = vmatpush.msra.mxu2 %v194_v9  ;;  %715 = vmatpush.msra.mxu3 %v211_v10  ;;  %v268_v38 = vld [vmem:[%s2383_s1 + $0x758] sm:$0xff]  ;;  %v285_v39 = vld [vmem:[%s2383_s1 + $0x7e0] sm:$0xff]  ;;  %v267_v42 = vld [vmem:[%s2383_s1 + $0x750] sm:$0xff] }
  0x64   :  { %657 = vmatpush.msra.mxu0 %v161_v11  ;;  %676 = vmatpush.msra.mxu1 %v178_v12  ;;  %v252_v41 = vld [vmem:[%s2383_s1 + $0x6d8] sm:$0xff]  ;;  %v234_v44 = vld [vmem:[%s2383_s1 + $0x648] sm:$0xff]  ;;  %v251_v45 = vld [vmem:[%s2383_s1 + $0x6d0] sm:$0xff] }
  0x65   :  { %697 = vmatpush.msra.mxu2 %v193_v13  ;;  %716 = vmatpush.msra.mxu3 %v210_v14  ;;  %v284_v43 = vld [vmem:[%s2383_s1 + $0x7d8] sm:$0xff]  ;;  %v266_v46 = vld [vmem:[%s2383_s1 + $0x748] sm:$0xff]  ;;  %v283_v47 = vld [vmem:[%s2383_s1 + $0x7d0] sm:$0xff] }
  0x66   :  { %658 = vmatmul.f32.vlgmr.msra.gmra.mxu0 %v1574_v26  ;;  %698 = vmatmul.f32.vlgmr.msra.gmra.mxu2 %v1576_v27  ;;  %v287_v26 = vld [vmem:[%s2383_s1 + $0x7f0] sm:$0xff]  ;;  %v237_v27 = vld [vmem:[%s2383_s1 + $0x660] sm:$0xff]  ;;  %v250_v49 = vld [vmem:[%s2383_s1 + $0x6c8] sm:$0xff] }
  0x67   :  { %722 = vmatpush.msrb.mxu0 %v240_v15  ;;  %762 = vmatpush.msrb.mxu2 %v272_v16  ;;  %v233_v48 = vld [vmem:[%s2383_s1 + $0x640] sm:$0xff]  ;;  %v282_v51 = vld [vmem:[%s2383_s1 + $0x7c8] sm:$0xff]  ;;  %v232_v52 = vld [vmem:[%s2383_s1 + $0x638] sm:$0xff] }
  0x68   :  { %677 = vmatpush.msra.mxu1 %v177_v17  ;;  %717 = vmatpush.msra.mxu3 %v209_v18  ;;  %v265_v50 = vld [vmem:[%s2383_s1 + $0x740] sm:$0xff]  ;;  %v264_v54 = vld [vmem:[%s2383_s1 + $0x738] sm:$0xff]  ;;  %v231_v56 = vld [vmem:[%s2383_s1 + $0x630] sm:$0xff] }
  0x69   :  { %678 = vmatmul.f32.vlgmr.msra.gmra.mxu1 %v1578_v28  ;;  %718 = vmatmul.f32.vlgmr.msra.gmra.mxu3 %v1586_v31  ;;  %v254_v28 = vld [vmem:[%s2383_s1 + $0x6e8] sm:$0xff]  ;;  %v249_v53 = vld [vmem:[%s2383_s1 + $0x6c0] sm:$0xff]  ;;  %v248_v57 = vld [vmem:[%s2383_s1 + $0x6b8] sm:$0xff] }
  0x6a   :  { %723 = vmatpush.msrb.mxu0 %v239_v19  ;;  %742 = vmatpush.msrb.mxu1 %v256_v20  ;;  %v32_v31 = vld [vmem:[%s2382_s0 + $0x28] sm:$0xff]  ;;  %v281_v55 = vld [vmem:[%s2383_s1 + $0x7c0] sm:$0xff]  ;;  %v263_v58 = vld [vmem:[%s2383_s1 + $0x730] sm:$0xff] }
  0x6b   :  { %763 = vmatpush.msrb.mxu2 %v271_v21  ;;  %782 = vmatpush.msrb.mxu3 %v288_v22  ;;  %449 = vst [vmem:[#allocation1 + $0x20] ss:$4 sm:$0xff] %v32_v31  ;;  %v280_v59 = vld [vmem:[%s2383_s1 + $0x7b8] sm:$0xff]  ;;  %v230_v60 = vld [vmem:[%s2383_s1 + $0x628] sm:$0xff]  ;;  %v247_v61 = vld [vmem:[%s2383_s1 + $0x6b0] sm:$0xff] }
  0x6c   :  { %724 = vmatpush.msrb.mxu0 %v238_v23  ;;  %743 = vmatpush.msrb.mxu1 %v255_v24  ;;  %v262_v62 = vld [vmem:[%s2383_s1 + $0x728] sm:$0xff]  ;;  %v279_v63 = vld [vmem:[%s2383_s1 + $0x7b0] sm:$0xff]  ;;  %v229_v0 = vld [vmem:[%s2383_s1 + $0x620] sm:$0xff] }
  0x6d   :  { %764 = vmatpush.msrb.mxu2 %v270_v25  ;;  %783 = vmatpush.msrb.mxu3 %v287_v26  ;;  %v246_v1 = vld [vmem:[%s2383_s1 + $0x6a8] sm:$0xff]  ;;  %v261_v2 = vld [vmem:[%s2383_s1 + $0x720] sm:$0xff]  ;;  %v228_v4 = vld [vmem:[%s2383_s1 + $0x618] sm:$0xff] }
  0x6e   :  { %725 = vmatpush.msrb.mxu0 %v237_v27  ;;  %744 = vmatpush.msrb.mxu1 %v254_v28  ;;  %v278_v3 = vld [vmem:[%s2383_s1 + $0x7a8] sm:$0xff]  ;;  %v245_v5 = vld [vmem:[%s2383_s1 + $0x6a0] sm:$0xff]  ;;  %v260_v6 = vld [vmem:[%s2383_s1 + $0x718] sm:$0xff] }
  0x6f   :  { %765 = vmatpush.msrb.mxu2 %v269_v34  ;;  %784 = vmatpush.msrb.mxu3 %v286_v35  ;;  %v277_v7 = vld [vmem:[%s2383_s1 + $0x7a0] sm:$0xff]  ;;  %v227_v8 = vld [vmem:[%s2383_s1 + $0x610] sm:$0xff]  ;;  %v244_v9 = vld [vmem:[%s2383_s1 + $0x698] sm:$0xff] }
  0x70   :  { %726 = vmatpush.msrb.mxu0 %v236_v36  ;;  %745 = vmatpush.msrb.mxu1 %v253_v37  ;;  %v259_v10 = vld [vmem:[%s2383_s1 + $0x710] sm:$0xff]  ;;  %v276_v11 = vld [vmem:[%s2383_s1 + $0x798] sm:$0xff]  ;;  %v226_v12 = vld [vmem:[%s2383_s1 + $0x608] sm:$0xff] }
  0x71   :  { %766 = vmatpush.msrb.mxu2 %v268_v38  ;;  %785 = vmatpush.msrb.mxu3 %v285_v39  ;;  %v243_v13 = vld [vmem:[%s2383_s1 + $0x690] sm:$0xff]  ;;  %v258_v14 = vld [vmem:[%s2383_s1 + $0x708] sm:$0xff]  ;;  %v225_v16 = vld [vmem:[%s2383_s1 + $0x600] sm:$0xff] }
  0x72   :  { %727 = vmatpush.msrb.mxu0 %v235_v40  ;;  %746 = vmatpush.msrb.mxu1 %v252_v41  ;;  %v275_v15 = vld [vmem:[%s2383_s1 + $0x790] sm:$0xff]  ;;  %v242_v17 = vld [vmem:[%s2383_s1 + $0x688] sm:$0xff]  ;;  %v257_v18 = vld [vmem:[%s2383_s1 + $0x700] sm:$0xff] }
  0x73   :  { %767 = vmatpush.msrb.mxu2 %v267_v42  ;;  %786 = vmatpush.msrb.mxu3 %v284_v43  ;;  %v274_v19 = vld [vmem:[%s2383_s1 + $0x788] sm:$0xff]  ;;  %v304_v20 = vld [vmem:[%s2383_s1 + $0x878] sm:$0xff]  ;;  %v241_v22 = vld [vmem:[%s2383_s1 + $0x680] sm:$0xff] }
  0x74   :  { %728 = vmatpush.msrb.mxu0 %v234_v44  ;;  %747 = vmatpush.msrb.mxu1 %v251_v45  ;;  %v336_v21 = vld [vmem:[%s2383_s1 + $0x978] sm:$0xff]  ;;  %v273_v23 = vld [vmem:[%s2383_s1 + $0x780] sm:$0xff]  ;;  %v303_v24 = vld [vmem:[%s2383_s1 + $0x870] sm:$0xff] }
  0x75   :  { %768 = vmatpush.msrb.mxu2 %v266_v46  ;;  %787 = vmatpush.msrb.mxu3 %v283_v47  ;;  %v320_v25 = vld [vmem:[%s2383_s1 + $0x8f8] sm:$0xff]  ;;  %v335_v26 = vld [vmem:[%s2383_s1 + $0x970] sm:$0xff]  ;;  %v334_v28 = vld [vmem:[%s2383_s1 + $0x968] sm:$0xff] }
  0x76   :  { %729 = vmatpush.msrb.mxu0 %v233_v48  ;;  %748 = vmatpush.msrb.mxu1 %v250_v49  ;;  %v352_v27 = vld [vmem:[%s2383_s1 + $0x9f8] sm:$0xff]  ;;  %v301_v31 = vld [vmem:[%s2383_s1 + $0x860] sm:$0xff]  ;;  %v350_v35 = vld [vmem:[%s2383_s1 + $0x9e8] sm:$0xff] }
  0x77   :  { %769 = vmatpush.msrb.mxu2 %v265_v50  ;;  %788 = vmatpush.msrb.mxu3 %v282_v51  ;;  %v333_v34 = vld [vmem:[%s2383_s1 + $0x960] sm:$0xff]  ;;  %v300_v36 = vld [vmem:[%s2383_s1 + $0x858] sm:$0xff]  ;;  %v299_v40 = vld [vmem:[%s2383_s1 + $0x850] sm:$0xff] }
  0x78   :  { %730 = vmatpush.msrb.mxu0 %v232_v52  ;;  %749 = vmatpush.msrb.mxu1 %v249_v53  ;;  %v317_v37 = vld [vmem:[%s2383_s1 + $0x8e0] sm:$0xff]  ;;  %v332_v38 = vld [vmem:[%s2383_s1 + $0x958] sm:$0xff]  ;;  %v331_v42 = vld [vmem:[%s2383_s1 + $0x950] sm:$0xff] }
  0x79   :  { %770 = vmatpush.msrb.mxu2 %v264_v54  ;;  %789 = vmatpush.msrb.mxu3 %v281_v55  ;;  %v349_v39 = vld [vmem:[%s2383_s1 + $0x9e0] sm:$0xff]  ;;  %v316_v41 = vld [vmem:[%s2383_s1 + $0x8d8] sm:$0xff]  ;;  %v298_v44 = vld [vmem:[%s2383_s1 + $0x848] sm:$0xff] }
  0x7a   :  { %731 = vmatpush.msrb.mxu0 %v231_v56  ;;  %750 = vmatpush.msrb.mxu1 %v248_v57  ;;  %v348_v43 = vld [vmem:[%s2383_s1 + $0x9d8] sm:$0xff]  ;;  %v315_v45 = vld [vmem:[%s2383_s1 + $0x8d0] sm:$0xff]  ;;  %v330_v46 = vld [vmem:[%s2383_s1 + $0x948] sm:$0xff] }
  0x7b   :  { %771 = vmatpush.msrb.mxu2 %v263_v58  ;;  %790 = vmatpush.msrb.mxu3 %v280_v59  ;;  %v347_v47 = vld [vmem:[%s2383_s1 + $0x9d0] sm:$0xff]  ;;  %v297_v48 = vld [vmem:[%s2383_s1 + $0x840] sm:$0xff]  ;;  %v314_v49 = vld [vmem:[%s2383_s1 + $0x8c8] sm:$0xff] }
  0x7c   :  { %732 = vmatpush.msrb.mxu0 %v230_v60  ;;  %751 = vmatpush.msrb.mxu1 %v247_v61  ;;  %v329_v50 = vld [vmem:[%s2383_s1 + $0x940] sm:$0xff]  ;;  %v346_v51 = vld [vmem:[%s2383_s1 + $0x9c8] sm:$0xff]  ;;  %v296_v52 = vld [vmem:[%s2383_s1 + $0x838] sm:$0xff] }
  0x7d   :  { %772 = vmatpush.msrb.mxu2 %v262_v62  ;;  %791 = vmatpush.msrb.mxu3 %v279_v63  ;;  %v313_v53 = vld [vmem:[%s2383_s1 + $0x8c0] sm:$0xff]  ;;  %v328_v54 = vld [vmem:[%s2383_s1 + $0x938] sm:$0xff]  ;;  %v295_v56 = vld [vmem:[%s2383_s1 + $0x830] sm:$0xff] }
  0x7e   :  { %733 = vmatpush.msrb.mxu0 %v229_v0  ;;  %752 = vmatpush.msrb.mxu1 %v246_v1  ;;  %v345_v55 = vld [vmem:[%s2383_s1 + $0x9c0] sm:$0xff]  ;;  %v312_v57 = vld [vmem:[%s2383_s1 + $0x8b8] sm:$0xff]  ;;  %v327_v58 = vld [vmem:[%s2383_s1 + $0x930] sm:$0xff] }
  0x7f   :  { %773 = vmatpush.msrb.mxu2 %v261_v2  ;;  %792 = vmatpush.msrb.mxu3 %v278_v3  ;;  %v344_v59 = vld [vmem:[%s2383_s1 + $0x9b8] sm:$0xff]  ;;  %v294_v60 = vld [vmem:[%s2383_s1 + $0x828] sm:$0xff]  ;;  %v311_v61 = vld [vmem:[%s2383_s1 + $0x8b0] sm:$0xff] }
  0x80   :  { %734 = vmatpush.msrb.mxu0 %v228_v4  ;;  %753 = vmatpush.msrb.mxu1 %v245_v5  ;;  %v326_v62 = vld [vmem:[%s2383_s1 + $0x928] sm:$0xff]  ;;  %v343_v63 = vld [vmem:[%s2383_s1 + $0x9b0] sm:$0xff]  ;;  %v293_v0 = vld [vmem:[%s2383_s1 + $0x820] sm:$0xff] }
  0x81   :  { %774 = vmatpush.msrb.mxu2 %v260_v6  ;;  %793 = vmatpush.msrb.mxu3 %v277_v7  ;;  %v310_v1 = vld [vmem:[%s2383_s1 + $0x8a8] sm:$0xff]  ;;  %v325_v2 = vld [vmem:[%s2383_s1 + $0x920] sm:$0xff]  ;;  %v292_v4 = vld [vmem:[%s2383_s1 + $0x818] sm:$0xff] }
  0x82   :  { %735 = vmatpush.msrb.mxu0 %v227_v8  ;;  %754 = vmatpush.msrb.mxu1 %v244_v9  ;;  %v342_v3 = vld [vmem:[%s2383_s1 + $0x9a8] sm:$0xff]  ;;  %v309_v5 = vld [vmem:[%s2383_s1 + $0x8a0] sm:$0xff]  ;;  %v324_v6 = vld [vmem:[%s2383_s1 + $0x918] sm:$0xff] }
  0x83   :  { %775 = vmatpush.msrb.mxu2 %v259_v10  ;;  %794 = vmatpush.msrb.mxu3 %v276_v11  ;;  %v341_v7 = vld [vmem:[%s2383_s1 + $0x9a0] sm:$0xff]  ;;  %v291_v8 = vld [vmem:[%s2383_s1 + $0x810] sm:$0xff]  ;;  %v308_v9 = vld [vmem:[%s2383_s1 + $0x898] sm:$0xff] }
  0x84   :  { %736 = vmatpush.msrb.mxu0 %v226_v12  ;;  %755 = vmatpush.msrb.mxu1 %v243_v13  ;;  %v323_v10 = vld [vmem:[%s2383_s1 + $0x910] sm:$0xff]  ;;  %v340_v11 = vld [vmem:[%s2383_s1 + $0x998] sm:$0xff]  ;;  %v290_v12 = vld [vmem:[%s2383_s1 + $0x808] sm:$0xff] }
  0x85   :  { %776 = vmatpush.msrb.mxu2 %v258_v14  ;;  %795 = vmatpush.msrb.mxu3 %v275_v15  ;;  %v307_v13 = vld [vmem:[%s2383_s1 + $0x890] sm:$0xff]  ;;  %v322_v14 = vld [vmem:[%s2383_s1 + $0x908] sm:$0xff] }
  0x86   :  { %737 = vmatpush.msrb.mxu0 %v225_v16  ;;  %756 = vmatpush.msrb.mxu1 %v242_v17  ;;  %v339_v15 = vld [vmem:[%s2383_s1 + $0x990] sm:$0xff]  ;;  %v289_v16 = vld [vmem:[%s2383_s1 + $0x800] sm:$0xff]  ;;  %v306_v17 = vld [vmem:[%s2383_s1 + $0x888] sm:$0xff] }
  0x87   :  { %777 = vmatpush.msrb.mxu2 %v257_v18  ;;  %796 = vmatpush.msrb.mxu3 %v274_v19  ;;  %v321_v18 = vld [vmem:[%s2383_s1 + $0x900] sm:$0xff]  ;;  %v338_v19 = vld [vmem:[%s2383_s1 + $0x988] sm:$0xff] }
  0x88   :  { %738 = vmatmul.f32.vlgmr.msrb.gmra.mxu0 %v1776_v29  ;;  %778 = vmatmul.f32.vlgmr.msrb.gmra.mxu2 %v1778_v30  ;;  %v302_v29 = vld [vmem:[%s2383_s1 + $0x868] sm:$0xff]  ;;  %v319_v30 = vld [vmem:[%s2383_s1 + $0x8f0] sm:$0xff] }
  0x89   :  { %802 = vmatpush.msra.mxu0 %v304_v20  ;;  %842 = vmatpush.msra.mxu2 %v336_v21  ;;  %v450_v20 = vld.sshfl [vmem:[#allocation1] sm:$0xff pattern:$0x73625140]  ;;  %v452_v21 = vld.sshfl [vmem:[#allocation1 + $0x10] sm:$0xff pattern:$0x73625140] }
  0x8a   :  { %757 = vmatpush.msrb.mxu1 %v241_v22  ;;  %797 = vmatpush.msrb.mxu3 %v273_v23  ;;  %v368_v22 = vld [vmem:[%s2383_s1 + $0xa78] sm:$0xff] }
  0x8b   :  { %758 = vmatmul.f32.vlgmr.msrb.gmra.mxu1 %v1780_v32  ;;  %798 = vmatmul.f32.vlgmr.msrb.gmra.mxu3 %v1788_v33  ;;  %v351_v32 = vld [vmem:[%s2383_s1 + $0x9f0] sm:$0xff]  ;;  %v318_v33 = vld [vmem:[%s2383_s1 + $0x8e8] sm:$0xff]  ;;  %v400_v23 = vld [vmem:[%s2383_s1 + $0xb78] sm:$0xff] }
  0x8c   :  { %803 = vmatpush.msra.mxu0 %v303_v24  ;;  %822 = vmatpush.msra.mxu1 %v320_v25  ;;  %v305_v24 = vld [vmem:[%s2383_s1 + $0x880] sm:$0xff] }
  0x8d   :  { %843 = vmatpush.msra.mxu2 %v335_v26  ;;  %862 = vmatpush.msra.mxu3 %v352_v27  ;;  %v337_v25 = vld [vmem:[%s2383_s1 + $0x980] sm:$0xff]  ;;  %v451_v26 = vld.sshfl [vmem:[#allocation1 + $0x8] sm:$0xff pattern:$0x73625140] }
  0x8e   :  { %804 = vmatpush.msra.mxu0 %v302_v29  ;;  %823 = vmatpush.msra.mxu1 %v319_v30  ;;  %v453_v27 = vld.sshfl [vmem:[#allocation1 + $0x18] sm:$0xff pattern:$0x73625140]  ;;  %v367_v29 = vld [vmem:[%s2383_s1 + $0xa70] sm:$0xff] }
  0x8f   :  { %844 = vmatpush.msra.mxu2 %v334_v28  ;;  %863 = vmatpush.msra.mxu3 %v351_v32  ;;  %v384_v30 = vld [vmem:[%s2383_s1 + $0xaf8] sm:$0xff]  ;;  %v399_v28 = vld [vmem:[%s2383_s1 + $0xb70] sm:$0xff] }
  0x90   :  { %805 = vmatpush.msra.mxu0 %v301_v31  ;;  %824 = vmatpush.msra.mxu1 %v318_v33  ;;  %v416_v32 = vld [vmem:[%s2383_s1 + $0xbf8] sm:$0xff]  ;;  %v366_v31 = vld [vmem:[%s2383_s1 + $0xa68] sm:$0xff]  ;;  %v383_v33 = vld [vmem:[%s2383_s1 + $0xaf0] sm:$0xff] }
  0x91   :  { %845 = vmatpush.msra.mxu2 %v333_v34  ;;  %864 = vmatpush.msra.mxu3 %v350_v35  ;;  %v398_v34 = vld [vmem:[%s2383_s1 + $0xb68] sm:$0xff]  ;;  %v415_v35 = vld [vmem:[%s2383_s1 + $0xbf0] sm:$0xff] }
  0x92   :  { %806 = vmatpush.msra.mxu0 %v300_v36  ;;  %825 = vmatpush.msra.mxu1 %v317_v37  ;;  %v365_v36 = vld [vmem:[%s2383_s1 + $0xa60] sm:$0xff]  ;;  %v382_v37 = vld [vmem:[%s2383_s1 + $0xae8] sm:$0xff] }
  0x93   :  { %846 = vmatpush.msra.mxu2 %v332_v38  ;;  %865 = vmatpush.msra.mxu3 %v349_v39  ;;  %v397_v38 = vld [vmem:[%s2383_s1 + $0xb60] sm:$0xff]  ;;  %v414_v39 = vld [vmem:[%s2383_s1 + $0xbe8] sm:$0xff] }
  0x94   :  { %807 = vmatpush.msra.mxu0 %v299_v40  ;;  %826 = vmatpush.msra.mxu1 %v316_v41  ;;  %v364_v40 = vld [vmem:[%s2383_s1 + $0xa58] sm:$0xff]  ;;  %v381_v41 = vld [vmem:[%s2383_s1 + $0xae0] sm:$0xff] }
  0x95   :  { %847 = vmatpush.msra.mxu2 %v331_v42  ;;  %866 = vmatpush.msra.mxu3 %v348_v43  ;;  %v396_v42 = vld [vmem:[%s2383_s1 + $0xb58] sm:$0xff]  ;;  %v413_v43 = vld [vmem:[%s2383_s1 + $0xbe0] sm:$0xff] }
  0x96   :  { %808 = vmatpush.msra.mxu0 %v298_v44  ;;  %827 = vmatpush.msra.mxu1 %v315_v45  ;;  %v363_v44 = vld [vmem:[%s2383_s1 + $0xa50] sm:$0xff]  ;;  %v380_v45 = vld [vmem:[%s2383_s1 + $0xad8] sm:$0xff] }
  0x97   :  { %848 = vmatpush.msra.mxu2 %v330_v46  ;;  %867 = vmatpush.msra.mxu3 %v347_v47  ;;  %v395_v46 = vld [vmem:[%s2383_s1 + $0xb50] sm:$0xff]  ;;  %v412_v47 = vld [vmem:[%s2383_s1 + $0xbd8] sm:$0xff] }
  0x98   :  { %809 = vmatpush.msra.mxu0 %v297_v48  ;;  %828 = vmatpush.msra.mxu1 %v314_v49  ;;  %v362_v48 = vld [vmem:[%s2383_s1 + $0xa48] sm:$0xff]  ;;  %v379_v49 = vld [vmem:[%s2383_s1 + $0xad0] sm:$0xff] }
  0x99   :  { %849 = vmatpush.msra.mxu2 %v329_v50  ;;  %868 = vmatpush.msra.mxu3 %v346_v51  ;;  %v394_v50 = vld [vmem:[%s2383_s1 + $0xb48] sm:$0xff]  ;;  %v411_v51 = vld [vmem:[%s2383_s1 + $0xbd0] sm:$0xff] }
  0x9a   :  { %810 = vmatpush.msra.mxu0 %v296_v52  ;;  %829 = vmatpush.msra.mxu1 %v313_v53  ;;  %v361_v52 = vld [vmem:[%s2383_s1 + $0xa40] sm:$0xff]  ;;  %v378_v53 = vld [vmem:[%s2383_s1 + $0xac8] sm:$0xff] }
  0x9b   :  { %850 = vmatpush.msra.mxu2 %v328_v54  ;;  %869 = vmatpush.msra.mxu3 %v345_v55  ;;  %v393_v54 = vld [vmem:[%s2383_s1 + $0xb40] sm:$0xff]  ;;  %v410_v55 = vld [vmem:[%s2383_s1 + $0xbc8] sm:$0xff] }
  0x9c   :  { %811 = vmatpush.msra.mxu0 %v295_v56  ;;  %830 = vmatpush.msra.mxu1 %v312_v57  ;;  %v360_v56 = vld [vmem:[%s2383_s1 + $0xa38] sm:$0xff]  ;;  %v377_v57 = vld [vmem:[%s2383_s1 + $0xac0] sm:$0xff] }
  0x9d   :  { %851 = vmatpush.msra.mxu2 %v327_v58  ;;  %870 = vmatpush.msra.mxu3 %v344_v59  ;;  %v392_v58 = vld [vmem:[%s2383_s1 + $0xb38] sm:$0xff]  ;;  %v409_v59 = vld [vmem:[%s2383_s1 + $0xbc0] sm:$0xff] }
  0x9e   :  { %812 = vmatpush.msra.mxu0 %v294_v60  ;;  %831 = vmatpush.msra.mxu1 %v311_v61  ;;  %v359_v60 = vld [vmem:[%s2383_s1 + $0xa30] sm:$0xff]  ;;  %v376_v61 = vld [vmem:[%s2383_s1 + $0xab8] sm:$0xff] }
  0x9f   :  { %852 = vmatpush.msra.mxu2 %v326_v62  ;;  %871 = vmatpush.msra.mxu3 %v343_v63  ;;  %v391_v62 = vld [vmem:[%s2383_s1 + $0xb30] sm:$0xff]  ;;  %v408_v63 = vld [vmem:[%s2383_s1 + $0xbb8] sm:$0xff] }
  0xa0   :  { %813 = vmatpush.msra.mxu0 %v293_v0  ;;  %832 = vmatpush.msra.mxu1 %v310_v1  ;;  %v358_v0 = vld [vmem:[%s2383_s1 + $0xa28] sm:$0xff]  ;;  %v375_v1 = vld [vmem:[%s2383_s1 + $0xab0] sm:$0xff] }
  0xa1   :  { %853 = vmatpush.msra.mxu2 %v325_v2  ;;  %872 = vmatpush.msra.mxu3 %v342_v3  ;;  %v390_v2 = vld [vmem:[%s2383_s1 + $0xb28] sm:$0xff]  ;;  %v407_v3 = vld [vmem:[%s2383_s1 + $0xbb0] sm:$0xff] }
  0xa2   :  { %814 = vmatpush.msra.mxu0 %v292_v4  ;;  %833 = vmatpush.msra.mxu1 %v309_v5  ;;  %v357_v4 = vld [vmem:[%s2383_s1 + $0xa20] sm:$0xff]  ;;  %v374_v5 = vld [vmem:[%s2383_s1 + $0xaa8] sm:$0xff] }
  0xa3   :  { %854 = vmatpush.msra.mxu2 %v324_v6  ;;  %873 = vmatpush.msra.mxu3 %v341_v7  ;;  %v389_v6 = vld [vmem:[%s2383_s1 + $0xb20] sm:$0xff]  ;;  %v406_v7 = vld [vmem:[%s2383_s1 + $0xba8] sm:$0xff] }
  0xa4   :  { %815 = vmatpush.msra.mxu0 %v291_v8  ;;  %834 = vmatpush.msra.mxu1 %v308_v9  ;;  %v356_v8 = vld [vmem:[%s2383_s1 + $0xa18] sm:$0xff]  ;;  %v373_v9 = vld [vmem:[%s2383_s1 + $0xaa0] sm:$0xff] }
  0xa5   :  { %855 = vmatpush.msra.mxu2 %v323_v10  ;;  %874 = vmatpush.msra.mxu3 %v340_v11  ;;  %v388_v10 = vld [vmem:[%s2383_s1 + $0xb18] sm:$0xff]  ;;  %v405_v11 = vld [vmem:[%s2383_s1 + $0xba0] sm:$0xff] }
  0xa6   :  { %816 = vmatpush.msra.mxu0 %v290_v12  ;;  %835 = vmatpush.msra.mxu1 %v307_v13  ;;  %v355_v12 = vld [vmem:[%s2383_s1 + $0xa10] sm:$0xff]  ;;  %v372_v13 = vld [vmem:[%s2383_s1 + $0xa98] sm:$0xff] }
  0xa7   :  { %856 = vmatpush.msra.mxu2 %v322_v14  ;;  %875 = vmatpush.msra.mxu3 %v339_v15  ;;  %v387_v14 = vld [vmem:[%s2383_s1 + $0xb10] sm:$0xff]  ;;  %v404_v15 = vld [vmem:[%s2383_s1 + $0xb98] sm:$0xff] }
  0xa8   :  { %817 = vmatpush.msra.mxu0 %v289_v16  ;;  %836 = vmatpush.msra.mxu1 %v306_v17  ;;  %v354_v16 = vld [vmem:[%s2383_s1 + $0xa08] sm:$0xff]  ;;  %v371_v17 = vld [vmem:[%s2383_s1 + $0xa90] sm:$0xff] }
  0xa9   :  { %857 = vmatpush.msra.mxu2 %v321_v18  ;;  %876 = vmatpush.msra.mxu3 %v338_v19  ;;  %v386_v18 = vld [vmem:[%s2383_s1 + $0xb08] sm:$0xff]  ;;  %v403_v19 = vld [vmem:[%s2383_s1 + $0xb90] sm:$0xff] }
  0xaa   :  { %818 = vmatmul.f32.vlgmr.msra.gmra.mxu0 %v450_v20  ;;  %858 = vmatmul.f32.vlgmr.msra.gmra.mxu2 %v452_v21  ;;  %v353_v20 = vld [vmem:[%s2383_s1 + $0xa00] sm:$0xff]  ;;  %v370_v21 = vld [vmem:[%s2383_s1 + $0xa88] sm:$0xff] }
  0xab   :  { %882 = vmatpush.msrb.mxu0 %v368_v22  ;;  %922 = vmatpush.msrb.mxu2 %v400_v23  ;;  %v385_v22 = vld [vmem:[%s2383_s1 + $0xb00] sm:$0xff]  ;;  %v402_v23 = vld [vmem:[%s2383_s1 + $0xb88] sm:$0xff] }
  0xac   :  { %837 = vmatpush.msra.mxu1 %v305_v24  ;;  %877 = vmatpush.msra.mxu3 %v337_v25  ;;  %v454_v24 = vld.sshfl [vmem:[#allocation1 + $0x20] sm:$0xff pattern:$0x73625140]  ;;  %v456_v25 = vld.sshfl [vmem:[#allocation1 + $0x30] sm:$0xff pattern:$0x73625140] }
  0xad   :  { %838 = vmatmul.f32.vlgmr.msra.gmra.mxu1 %v451_v26  ;;  %878 = vmatmul.f32.vlgmr.msra.gmra.mxu3 %v453_v27  ;;  %v369_v26 = vld [vmem:[%s2383_s1 + $0xa80] sm:$0xff] }
  0xae   :  { %883 = vmatpush.msrb.mxu0 %v367_v29  ;;  %902 = vmatpush.msrb.mxu1 %v384_v30  ;;  %v401_v27 = vld [vmem:[%s2383_s1 + $0xb80] sm:$0xff]  ;;  %v455_v29 = vld.sshfl [vmem:[#allocation1 + $0x28] sm:$0xff pattern:$0x73625140] }
  0xaf   :  { %923 = vmatpush.msrb.mxu2 %v399_v28  ;;  %942 = vmatpush.msrb.mxu3 %v416_v32  ;;  %v457_v30 = vld.sshfl [vmem:[#allocation1 + $0x38] sm:$0xff pattern:$0x73625140]  ;;  %v1052_v28 = vld [vmem:[%s2384_s2] ss:$0 sm:$0xff]  ;;  %s1038_s2 = sshll.u32 %s1081_s9, 4  ;;  %s1039_s2 = int_to_ptr.vmem [resolvable:$true] %s1038_s2 }
  0xb0   :  { %884 = vmatpush.msrb.mxu0 %v366_v31  ;;  %903 = vmatpush.msrb.mxu1 %v383_v33 }
  0xb1   :  { %924 = vmatpush.msrb.mxu2 %v398_v34  ;;  %943 = vmatpush.msrb.mxu3 %v415_v35 }
  0xb2   :  { %885 = vmatpush.msrb.mxu0 %v365_v36  ;;  %904 = vmatpush.msrb.mxu1 %v382_v37 }
  0xb3   :  { %925 = vmatpush.msrb.mxu2 %v397_v38  ;;  %944 = vmatpush.msrb.mxu3 %v414_v39  ;;  %v970_v38 = vld [vmem:[%s2385_s3 + $0x38] sm:$0xff] }
  0xb4   :  { %886 = vmatpush.msrb.mxu0 %v364_v40  ;;  %905 = vmatpush.msrb.mxu1 %v381_v41 }
  0xb5   :  { %926 = vmatpush.msrb.mxu2 %v396_v42  ;;  %945 = vmatpush.msrb.mxu3 %v413_v43 }
  0xb6   :  { %887 = vmatpush.msrb.mxu0 %v363_v44  ;;  %906 = vmatpush.msrb.mxu1 %v380_v45 }
  0xb7   :  { %927 = vmatpush.msrb.mxu2 %v395_v46  ;;  %946 = vmatpush.msrb.mxu3 %v412_v47 }
  0xb8   :  { %888 = vmatpush.msrb.mxu0 %v362_v48  ;;  %907 = vmatpush.msrb.mxu1 %v379_v49 }
  0xb9   :  { %928 = vmatpush.msrb.mxu2 %v394_v50  ;;  %947 = vmatpush.msrb.mxu3 %v411_v51  ;;  %v969_v51 = vld [vmem:[%s2385_s3 + $0x30] sm:$0xff] }
  0xba   :  { %889 = vmatpush.msrb.mxu0 %v361_v52  ;;  %908 = vmatpush.msrb.mxu1 %v378_v53 }
  0xbb   :  { %929 = vmatpush.msrb.mxu2 %v393_v54  ;;  %948 = vmatpush.msrb.mxu3 %v410_v55  ;;  %v968_v54 = vld [vmem:[%s2385_s3 + $0x28] sm:$0xff] }
  0xbc   :  { %890 = vmatpush.msrb.mxu0 %v360_v56  ;;  %909 = vmatpush.msrb.mxu1 %v377_v57  ;;  %v967_v56 = vld [vmem:[%s2385_s3 + $0x20] sm:$0xff] }
  0xbd   :  { %930 = vmatpush.msrb.mxu2 %v392_v58  ;;  %949 = vmatpush.msrb.mxu3 %v409_v59  ;;  %v966_v58 = vld [vmem:[%s2385_s3 + $0x18] sm:$0xff] }
  0xbe   :  { %891 = vmatpush.msrb.mxu0 %v359_v60  ;;  %910 = vmatpush.msrb.mxu1 %v376_v61  ;;  %v965_v61 = vld [vmem:[%s2385_s3 + $0x10] sm:$0xff] }
  0xbf   :  { %931 = vmatpush.msrb.mxu2 %v391_v62  ;;  %950 = vmatpush.msrb.mxu3 %v408_v63  ;;  %v499_v32 = vpop.f32.mrf.mxu0  ;;  %v964_v63 = vld [vmem:[%s2385_s3 + $0x8] sm:$0xff] }
  0xc0   :  { %892 = vmatpush.msrb.mxu0 %v358_v0  ;;  %911 = vmatpush.msrb.mxu1 %v375_v1  ;;  %v500_v31 = vadd.f32 %v1052_v28, %v499_v32  ;;  %v963_v1 = vld [vmem:[%s2385_s3] sm:$0xff] }
  0xc1   :  { %932 = vmatpush.msrb.mxu2 %v390_v2  ;;  %951 = vmatpush.msrb.mxu3 %v407_v3 }
  0xc2   :  { %893 = vmatpush.msrb.mxu0 %v357_v4  ;;  %912 = vmatpush.msrb.mxu1 %v374_v5  ;;  %v519_v33 = vpop.f32.mrf.mxu1  ;;  %v1003_v4 = vld [vmem:[%s2387_s5 + $0x18] sm:$0xff]  ;;  %v1002_v5 = vld [vmem:[%s2387_s5 + $0x10] sm:$0xff] }
  0xc3   :  { %933 = vmatpush.msrb.mxu2 %v389_v6  ;;  %952 = vmatpush.msrb.mxu3 %v406_v7  ;;  %v520_v34 = vadd.f32 %v519_v33, %v500_v31  ;;  %v1054_v31 = vld [vmem:[%s2388_s6] ss:$0 sm:$0xff] }
  0xc4   :  { %894 = vmatpush.msrb.mxu0 %v356_v8  ;;  %913 = vmatpush.msrb.mxu1 %v373_v9 }
  0xc5   :  { %934 = vmatpush.msrb.mxu2 %v388_v10  ;;  %953 = vmatpush.msrb.mxu3 %v405_v11  ;;  %v539_v35 = vpop.f32.mrf.mxu2 }
  0xc6   :  { %895 = vmatpush.msrb.mxu0 %v355_v12  ;;  %914 = vmatpush.msrb.mxu1 %v372_v13  ;;  %v540_v36 = vadd.f32 %v539_v35, %v520_v34 }
  0xc7   :  { %935 = vmatpush.msrb.mxu2 %v387_v14  ;;  %954 = vmatpush.msrb.mxu3 %v404_v15 }
  0xc8   :  { %896 = vmatpush.msrb.mxu0 %v354_v16  ;;  %915 = vmatpush.msrb.mxu1 %v371_v17  ;;  %v559_v37 = vpop.f32.mrf.mxu3 }
  0xc9   :  { %936 = vmatpush.msrb.mxu2 %v386_v18  ;;  %955 = vmatpush.msrb.mxu3 %v403_v19  ;;  %v560_v39 = vadd.f32 %v559_v37, %v540_v36 }
  0xca   :  { %897 = vmatpush.msrb.mxu0 %v353_v20  ;;  %916 = vmatpush.msrb.mxu1 %v370_v21 }
  0xcb   :  { %937 = vmatpush.msrb.mxu2 %v385_v22  ;;  %956 = vmatpush.msrb.mxu3 %v402_v23  ;;  %v579_v40 = vpop.f32.mrf.mxu0 }
  0xcc   :  { %898 = vmatmul.f32.vlgmr.msrb.gmra.mxu0 %v454_v24  ;;  %938 = vmatmul.f32.vlgmr.msrb.gmra.mxu2 %v456_v25  ;;  %v580_v41 = vadd.f32 %v579_v40, %v560_v39 }
  0xcd   :  { %917 = vmatpush.msrb.mxu1 %v369_v26  ;;  %957 = vmatpush.msrb.mxu3 %v401_v27  ;;  %v1001_v26 = vld [vmem:[%s2387_s5 + $0x8] sm:$0xff]  ;;  %v1000_v27 = vld [vmem:[%s2387_s5] sm:$0xff]  ;;  %s1040_s5 = sshll.u32 %s2389_s7, 4  ;;  %s1041_s5 = int_to_ptr.hbm [resolvable:$true] %s1040_s5 }
  0xce   :  { %918 = vmatmul.f32.vlgmr.msrb.gmra.mxu1 %v455_v29  ;;  %958 = vmatmul.f32.vlgmr.msrb.gmra.mxu3 %v457_v30  ;;  %v599_v42 = vpop.f32.mrf.mxu1  ;;  %v1053_v29 = vld [vmem:[%s2386_s4] ss:$0 sm:$0xff] }
  0xcf   :  { %987 = vmatpush.msra.mxu0 %v970_v38  ;;  %v600_v43 = vadd.f32 %v599_v42, %v580_v41  ;;  %v619_v44 = vpop.f32.mrf.mxu2  ;;  %1024 = vmatpush.msra.mxu1 %v1003_v4 }
  0xd1   :  { %v620_v45 = vadd.f32 %v619_v44, %v600_v43  ;;  %988 = vmatpush.msra.mxu0 %v969_v51  ;;  %1025 = vmatpush.msra.mxu1 %v1002_v5 }
  0xd2   :  { %v639_v46 = vpop.f32.mrf.mxu3 }
  0xd3   :  { %v640_v48 = vadd.f32 %v639_v46, %v620_v45  ;;  %989 = vmatpush.msra.mxu0 %v968_v54  ;;  %1026 = vmatpush.msra.mxu1 %v1001_v26 }
  0xd5   :  { %990 = vmatpush.msra.mxu0 %v967_v56  ;;  %1027 = vmatpush.msra.mxu1 %v1000_v27 }
  0xd7   :  { %991 = vmatpush.msra.mxu0 %v966_v58 }
  0xd9   :  { %992 = vmatpush.msra.mxu0 %v965_v61 }
  0xdb   :  { %993 = vmatpush.msra.mxu0 %v964_v63 }
  0xdd   :  { %994 = vmatpush.msra.mxu0 %v963_v1 }
  0xe3   :  { %v659_v47 = vpop.f32.mrf.mxu0 }
  0xe4   :  { %v660_v49 = vadd.f32 %v659_v47, %v640_v48 }
  0xe6   :  { %v679_v50 = vpop.f32.mrf.mxu1 }
  0xe7   :  { %v680_v53 = vadd.f32 %v679_v50, %v660_v49 }
  0xe9   :  { %v699_v52 = vpop.f32.mrf.mxu2 }
  0xea   :  { %v700_v55 = vadd.f32 %v699_v52, %v680_v53 }
  0xec   :  { %v719_v57 = vpop.f32.mrf.mxu3 }
  0xed   :  { %v720_v60 = vadd.f32 %v719_v57, %v700_v55 }
 0x105   :  { %v739_v59 = vpop.f32.mrf.mxu0 }
 0x106   :  { %v740_v62 = vadd.f32 %v739_v59, %v720_v60 }
 0x108   :  { %v759_v0 = vpop.f32.mrf.mxu1 }
 0x109   :  { %v760_v3 = vadd.f32 %v759_v0, %v740_v62 }
 0x10b   :  { %v779_v2 = vpop.f32.mrf.mxu2 }
 0x10c   :  { %v780_v6 = vadd.f32 %v779_v2, %v760_v3 }
 0x10e   :  { %v799_v7 = vpop.f32.mrf.mxu3 }
 0x10f   :  { %v800_v9 = vadd.f32 %v799_v7, %v780_v6 }
 0x127   :  { %v819_v8 = vpop.f32.mrf.mxu0 }
 0x128   :  { %v820_v10 = vadd.f32 %v819_v8, %v800_v9 }
 0x12a   :  { %v839_v11 = vpop.f32.mrf.mxu1 }
 0x12b   :  { %v840_v13 = vadd.f32 %v839_v11, %v820_v10 }
 0x12d   :  { %v859_v12 = vpop.f32.mrf.mxu2 }
 0x12e   :  { %v860_v14 = vadd.f32 %v859_v12, %v840_v13 }
 0x130   :  { %v879_v15 = vpop.f32.mrf.mxu3 }
 0x131   :  { %v880_v16 = vadd.f32 %v879_v15, %v860_v14 }
 0x149   :  { %v899_v17 = vpop.f32.mrf.mxu0 }
 0x14a   :  { %v900_v18 = vadd.f32 %v899_v17, %v880_v16 }
 0x14b   :  { %v919_v19 = vpop.f32.mrf.mxu1 }
 0x14c   :  { %v920_v20 = vadd.f32 %v919_v19, %v900_v18 }
 0x14f   :  { %v939_v21 = vpop.f32.mrf.mxu2 }
 0x150   :  { %v940_v22 = vadd.f32 %v939_v21, %v920_v20 }
 0x151   :  { %v959_v23 = vpop.f32.mrf.mxu3 }
 0x152   :  { %v960_v24 = vadd.f32 %v959_v23, %v940_v22 }
 0x154   :  { %v962_v25 = vmax.f32 %v960_v24, 0.0 }
 0x156   :  { %1049 = vmatmul.msk.f32.vlgmr.msra.gmra.mxu0 %vm975_vm0, %v962_v25 }
 0x1d3   :  { %v996_v30 = vpop.f32.mrf.mxu0 }
 0x1d4   :  { %v997_v28 = vadd.f32 %v1053_v29, %v996_v30 }
 0x1d6   :  { %v999_v32 = vmax.f32 %v997_v28, 0.0 }
 0x1d8   :  { %1050 = vmatmul.msk.f32.vlgmr.msra.gmra.mxu1 %vm1008_vm1, %v999_v32 }
 0x255   :  { %v1029_v33 = vpop.f32.mrf.mxu1 }
 0x256   :  { %v1030_v34 = vadd.f32 %v1054_v31, %v1029_v33 }
 0x258   :  { %1032 = vst [vmem:[#allocation2] sm:$0x3] %v1030_v34 }
 0x259   :  { %1043 = dma.vmem_to_hbm [thread:$0]  %s1039_s2, 32, %s1041_s5, [#allocation3]  }
 0x25a   :  { %1079 = dma.done.wait [#allocation3], 32  }
 0x25b   :  { %1080 = vsyncadd [#allocation3], 4294967264 }
 0x25c   :  { %1048 = vsyncpa [#allocation3], 1 }

</bundles_post_ra>
